<compile_context>
chip_gen: v5e
topology: v5e:2x2
jax: 0.10.0
libtpu: 0.0.40
codegen_flags: <defaults>
</compile_context>

<pallas_src>
import functools

import jax
import jax.numpy as jnp
from jax.experimental import pallas as pl
from jax.experimental.pallas import tpu as pltpu

# Belt-and-braces: make XLA-side matmuls (reference, host folds) exact f32 too.
jax.config.update("jax_default_matmul_precision", "highest")

NEG_SLOPE = 0.2
HIGHEST = jax.lax.Precision.HIGHEST


def _lrelu(x):
    # identical to LeakyReLU(0.2) for 0 < slope < 1; one fewer VALU pass than
    # where(x > 0, x, 0.2 * x).
    return jnp.maximum(x, NEG_SLOPE * x)


# ---------------------------------------------------------------------------
# kernel
# ---------------------------------------------------------------------------
def mhag_kernel(embs_ref, embst_ref, cm_ref, pde_ref, adj_ref,
                pcw2_ref, wa1_ref, wa2_ref, ab_ref,
                chwe_ref, chwn_ref, chb_ref, out_ref):
    tile, n, e = pde_ref.shape
    he = cm_ref.shape[1]
    n_heads = he // e

    embs = embs_ref[...]            # (N, E)   full, resident (for attn @ embs)
    embs_tile = embst_ref[...]      # (TILE, E) this grid step's query rows
    adj = adj_ref[...]              # (TILE, N)
    pde = pde_ref[...]              # (TILE, N, E)  bf16 in production

    # pde half of the pc pre-activation, all heads lane-stacked (one wide dot).
    pde_part = jnp.dot(pde.reshape(tile * n, e), pcw2_ref[...],
                       preferred_element_type=jnp.float32,
                       precision=HIGHEST).reshape(tile, n, he)
    # cm half (+ pcb) is tile-invariant and precomputed on the host (cm_ref).
    pc_all = _lrelu(cm_ref[...][None, :, :] + pde_part)          # (TILE, N, H*E)

    # additive neighbor mask.  Binary adjacency with self-loops: 0 where
    # adj == 1, f32.min otherwise (torch's nan_to_num((adj-1)*inf) semantics;
    # the adj > 1 -> +max branch is intentionally dropped, see header note).
    f32 = jnp.finfo(jnp.float32)
    me = jnp.where(adj == 1.0, 0.0, f32.min)                     # (TILE, N)

    # fused `ch` projection: head-summed embs block + bias.
    acc = jnp.dot(embs_tile, chwe_ref[...],
                  preferred_element_type=jnp.float32,
                  precision=HIGHEST) + chb_ref[...]              # (TILE, E)

    nbc_cols = []
    for h in range(n_heads):        # static unroll; fine for small H
        lo = h * e
        pc_h = pc_all[:, :, lo:lo + e]                           # (TILE, N, E)
        # (lrelu(pc) @ W^T) @ a2 == lrelu(pc) @ (W^T a2): VPU mul + lane reduce
        pcsum = jnp.sum(pc_h * wa2_ref[h][None, :, :], axis=-1)  # (TILE, N)
        # (embs @ W^T) @ a1 == embs @ (W^T a1)
        rm = jnp.sum(embs_tile * wa1_ref[h], axis=-1, keepdims=True)  # (TILE, 1)
        mf = _lrelu(rm + pcsum + ab_ref[h])                      # (TILE, N)

        # masked, numerically stabilized softmax along the neighbor axis
        logits = mf + me
        logits = logits - jnp.max(logits, axis=-1, keepdims=True)
        p = jnp.exp(logits)
        attn = p / jnp.sum(p, axis=-1, keepdims=True)            # exact division

        nbc_cols.append(jnp.dot(attn, embs,
                                preferred_element_type=jnp.float32,
                                precision=HIGHEST))              # (TILE, E)

    # batched epilogue: one (TILE, H*E) @ (H*E, E) dot instead of H narrow ones
    nbc_all = jnp.concatenate(nbc_cols, axis=-1)                 # (TILE, H*E)
    acc = acc + jnp.dot(nbc_all, chwn_ref[...],
                        preferred_element_type=jnp.float32,
                        precision=HIGHEST)
    out_ref[...] = acc


# ---------------------------------------------------------------------------
# tiling / VMEM planning
# ---------------------------------------------------------------------------
def _vmem_capacity_bytes():
    try:
        info = pltpu.get_tpu_info()
        cap = getattr(info, "vmem_capacity_bytes", None)
        if cap:
            return int(cap)
    except Exception:
        pass
    return 64 * 1024 * 1024   # v7x per-TC size: safe lower bound for all gens


def _plan(n, e, h, stream_itemsize):
    """VMEM-budget-aware row tile + scoped-VMEM limit."""
    he = h * e
    cap = _vmem_capacity_bytes()
    budget = (cap * 7) // 10                                      # headroom

    # resident, single-buffered shared operands
    resident = 4 * (n * e + n * he)                               # embs + cm_all
    resident += stream_itemsize * e * he                          # pcw2 (stacked)
    resident += 4 * (2 * h * e + h + e * e + he * e + e)          # wa*, ab, ch*, chb

    # per tile-row: double-buffered streamed tiles + live f32 intermediates
    per_row = 2 * (n * e * stream_itemsize + n * 4 + 2 * e * 4)   # pde, adj, embs_tile/out
    per_row += 8 * n * he                                         # pde_part + pc_all
    per_row += 8 * n * 4                                          # scores / softmax temps
    per_row = max(per_row, 1)

    max_rows = max(8, ((budget - resident) // per_row) // 8 * 8)

    cands = sorted({d for d in range(8, n + 1, 8) if n % d == 0} | {n})
    feasible = [c for c in cands if c <= max_rows] or [cands[0]]
    # prefer >= 2 grid steps so both v7x TensorCores get work
    split = [c for c in feasible if n // c >= 2]
    tile = max(split) if split else max(feasible)

    est = resident + per_row * tile
    vmem_limit = int(min((cap * 17) // 20, max(32 * 1024 * 1024, 2 * est)))
    return tile, vmem_limit


# ---------------------------------------------------------------------------
# wrapper (host-side algebraic folds, exact up to fp reassociation)
# ---------------------------------------------------------------------------
def mhag_forward(embs, adj, pdj, params, *, stream_dtype=jnp.float32):
    N, E = embs.shape
    H = params["W"].shape[0]
    HE = H * E

    # glue: pe = cat([embs, zeros(1,E)]); pde = pe[pdj]  (gather kept in XLA)
    pe = jnp.concatenate([embs, jnp.zeros((1, E), embs.dtype)], axis=0)
    pde = pe[pdj].astype(stream_dtype)                            # (N, N, E)

    wt = jnp.swapaxes(params["W"], 1, 2)                          # (H,E,E) = W^T
    pcw1_t = jnp.swapaxes(params["pcW"][:, :, :E], 1, 2)          # pcW1^T
    pcw2_t = jnp.swapaxes(params["pcW"][:, :, E:], 1, 2)          # pcW2^T
    cmw = jnp.einsum("hij,hjk->hik", wt, pcw1_t, precision=HIGHEST)   # W^T pcW1^T
    cmw_stk = jnp.transpose(cmw, (1, 0, 2)).reshape(E, HE)        # (E, H*E)
    pcw2_stk = jnp.transpose(pcw2_t, (1, 0, 2)).reshape(E, HE).astype(stream_dtype)
    pcb_stk = params["pcb"].reshape(1, HE)
    # tile-invariant cm contribution, pcb folded in (hoisted out of the grid)
    cm_all = jnp.dot(embs, cmw_stk, precision=HIGHEST) + pcb_stk  # (N, H*E)

    a1 = params["aW"][:, 0, :E]                                   # (H, E)
    a2 = params["aW"][:, 0, E:]                                   # (H, E)
    wa1 = jnp.einsum("hej,hj->he", wt, a1, precision=HIGHEST)[:, None, :]  # (H,1,E)
    wa2 = jnp.einsum("hej,hj->he", wt, a2, precision=HIGHEST)[:, None, :]  # (H,1,E)
    ab = params["ab"].reshape(H).astype(jnp.float32)              # SMEM scalars

    ch_wt = params["chW"].T.reshape(H, 2, E, E)                   # (H,[embs|nbc],E,E)
    chw_e = jnp.sum(ch_wt[:, 0], axis=0)                          # (E, E) head-summed
    chw_n = ch_wt[:, 1].reshape(HE, E)                            # (H*E, E) lane-stacked
    chb = params["chb"].reshape(1, E)

    TILE, vmem_limit = _plan(N, E, H, jnp.dtype(stream_dtype).itemsize)
    grid = (N // TILE,)

    def shared(shape):
        return pl.BlockSpec(shape, lambda i: (0,) * len(shape))

    return pl.pallas_call(
        mhag_kernel,
        out_shape=jax.ShapeDtypeStruct((N, E), jnp.float32),
        grid=grid,
        in_specs=[
            shared((N, E)),                                       # embs (full, resident)
            pl.BlockSpec((TILE, E), lambda i: (i, 0)),            # embs row tile
            shared((N, HE)),                                      # cm_all (+pcb, hoisted)
            pl.BlockSpec((TILE, N, E), lambda i: (i, 0, 0)),      # pde row tile
            pl.BlockSpec((TILE, N), lambda i: (i, 0)),            # adj row tile
            shared((E, HE)),                                      # pcW2 (stacked)
            shared((H, 1, E)),                                    # W^T a1
            shared((H, 1, E)),                                    # W^T a2
            pl.BlockSpec(memory_space=pltpu.MemorySpace.SMEM),    # a bias scalars
            shared((E, E)),                                       # ch weight, embs part
            shared((HE, E)),                                      # ch weight, nbc part
            shared((1, E)),                                       # ch bias
        ],
        out_specs=pl.BlockSpec((TILE, E), lambda i: (i, 0)),
        compiler_params=pltpu.CompilerParams(
            dimension_semantics=("parallel",),
            vmem_limit_bytes=vmem_limit),
    )(embs, embs, cm_all, pde, adj, pcw2_stk, wa1, wa2, ab,
      chw_e, chw_n, chb)


# ---------------------------------------------------------------------------
# pure-JAX reference mirroring the PyTorch forward (unfolded weights)
# ---------------------------------------------------------------------------
def mhag_ref(embs, adj, pdj, params):
    N, E = embs.shape
    H = params["W"].shape[0]
    pe = jnp.concatenate([embs, jnp.zeros((1, E), embs.dtype)], axis=0)
    pde = pe[pdj]
    f32 = jnp.finfo(jnp.float32)
    mm = lambda a, b: jnp.matmul(a, b, precision=HIGHEST)
    res = []
    for h in range(H):
        W, pcW, pcb = params["W"][h], params["pcW"][h], params["pcb"][h]
        aW, ab = params["aW"][h], params["ab"][h]
        wf = mm(embs, W.T)
        rm = jnp.broadcast_to(wf[:, None, :], (N, N, E))
        cm = jnp.broadcast_to(wf[None, :, :], (N, N, E))
        pc = _lrelu(mm(jnp.concatenate([cm, pde], axis=2), pcW.T) + pcb)
        pc = mm(pc, W.T)
        mf = _lrelu((mm(jnp.concatenate([rm, pc], axis=2), aW.T) + ab)[..., 0])
        # torch.nan_to_num((adj - 1) * inf)
        me = jnp.where(adj == 1.0, 0.0, jnp.where(adj > 1.0, f32.max, f32.min))
        attn = jax.nn.softmax(mf + me, axis=1)
        nbc = mm(attn, embs)
        res.append(jnp.concatenate([embs, nbc], axis=1))
    x = jnp.concatenate(res, axis=1)
    return mm(x, params["chW"].T) + params["chb"]


if __name__ == "__main__":
    key = jax.random.PRNGKey(0)
    N, E, H = 8, 32, 2
    ks = jax.random.split(key, 10)

    embs = jax.random.normal(ks[0], (N, E), jnp.float32)
    adj = (jax.random.uniform(ks[1], (N, N)) > 0.5).astype(jnp.float32)
    adj = jnp.maximum(adj, jnp.eye(N, dtype=jnp.float32))   # self-edges: finite rows
    pdj = jax.random.randint(ks[2], (N, N), 0, N + 1)       # indexes pe = [embs; 0]

    s = 0.1
    params = dict(
        W=s * jax.random.normal(ks[3], (H, E, E), jnp.float32),        # Linear(E,E), no bias
        pcW=s * jax.random.normal(ks[4], (H, E, 2 * E), jnp.float32),  # Linear(2E,E)
        pcb=s * jax.random.normal(ks[5], (H, E), jnp.float32),
        aW=s * jax.random.normal(ks[6], (H, 1, 2 * E), jnp.float32),   # Linear(2E,1)
        ab=s * jax.random.normal(ks[7], (H, 1), jnp.float32),
        chW=s * jax.random.normal(ks[8], (E, 2 * E * H), jnp.float32), # Linear(2EH,E)
        chb=s * jax.random.normal(ks[9], (E,), jnp.float32),
    )

    ref = mhag_ref(embs, adj, pdj, params)

    # exact-f32 path: tight numerics check
    fwd = jax.jit(mhag_forward)
    out = jax.block_until_ready(fwd(embs, adj, pdj, params))
    assert out.shape == (N, E)
    assert bool(jnp.allclose(out, ref, rtol=2e-3, atol=2e-3)), (
        "f32 kernel mismatch: max |err| = %e"
        % float(jnp.max(jnp.abs(out - ref))))

    # production path: bf16 streaming of the dominant (N, N, E) pde tensor
    fwd_bf16 = jax.jit(functools.partial(mhag_forward, stream_dtype=jnp.bfloat16))
    out16 = jax.block_until_ready(fwd_bf16(embs, adj, pdj, params))
    assert bool(jnp.all(jnp.isfinite(out16)))
    assert bool(jnp.allclose(out16, ref, rtol=2e-2, atol=2e-2)), (
        "bf16-streaming kernel mismatch: max |err| = %e"
        % float(jnp.max(jnp.abs(out16 - ref))))

    print("KERNEL_OK")
</pallas_src>

<mosaic_0001>
module attributes {stable_mosaic.version = 11 : i64} {
  func.func @mhag_kernel(%arg0: i32, %arg1: memref<8x32xf32, #tpu.memory_space<vmem>>, %arg2: memref<8x32xf32, #tpu.memory_space<vmem>>, %arg3: memref<8x64xf32, #tpu.memory_space<vmem>>, %arg4: memref<8x8x32xf32, #tpu.memory_space<vmem>>, %arg5: memref<8x8xf32, #tpu.memory_space<vmem>>, %arg6: memref<32x64xf32, #tpu.memory_space<vmem>>, %arg7: memref<2x1x32xf32, #tpu.memory_space<vmem>>, %arg8: memref<2x1x32xf32, #tpu.memory_space<vmem>>, %arg9: memref<2xf32, #tpu.memory_space<smem>>, %arg10: memref<32x32xf32, #tpu.memory_space<vmem>>, %arg11: memref<64x32xf32, #tpu.memory_space<vmem>>, %arg12: memref<1x32xf32, #tpu.memory_space<vmem>>, %arg13: memref<8x32xf32, #tpu.memory_space<vmem>>) attributes {dimension_semantics = [#tpu.dimension_semantics<parallel>], iteration_bounds = array<i64: 1>, scalar_prefetch = 0 : i64, scratch_operands = 0 : i64, tpu.core_type = #tpu.core_type<tc>, window_params = [{pipeline_mode = #tpu.pipeline_mode<synchronous>, transform_indices = @transform_0, window_bounds = array<i64: 8, 32>}, {transform_indices = @transform_1, window_bounds = array<i64: 8, 32>}, {pipeline_mode = #tpu.pipeline_mode<synchronous>, transform_indices = @transform_2, window_bounds = array<i64: 8, 64>}, {transform_indices = @transform_3, window_bounds = array<i64: 8, 8, 32>}, {transform_indices = @transform_4, window_bounds = array<i64: 8, 8>}, {pipeline_mode = #tpu.pipeline_mode<synchronous>, transform_indices = @transform_5, window_bounds = array<i64: 32, 64>}, {pipeline_mode = #tpu.pipeline_mode<synchronous>, transform_indices = @transform_6, window_bounds = array<i64: 2, 1, 32>}, {pipeline_mode = #tpu.pipeline_mode<synchronous>, transform_indices = @transform_7, window_bounds = array<i64: 2, 1, 32>}, {transform_indices = @transform_8, window_bounds = array<i64: 2>}, {pipeline_mode = #tpu.pipeline_mode<synchronous>, transform_indices = @transform_9, window_bounds = array<i64: 32, 32>}, {pipeline_mode = #tpu.pipeline_mode<synchronous>, transform_indices = @transform_10, window_bounds = array<i64: 64, 32>}, {pipeline_mode = #tpu.pipeline_mode<synchronous>, transform_indices = @transform_11, window_bounds = array<i64: 1, 32>}, {transform_indices = @transform_12, window_bounds = array<i64: 8, 32>}]} {
    %c0 = arith.constant 0 : index
    %c0_0 = arith.constant 0 : index
    %0 = vector.load %arg1[%c0, %c0_0] : memref<8x32xf32, #tpu.memory_space<vmem>>, vector<8x32xf32>
    %c0_1 = arith.constant 0 : index
    %c0_2 = arith.constant 0 : index
    %1 = vector.load %arg2[%c0_1, %c0_2] : memref<8x32xf32, #tpu.memory_space<vmem>>, vector<8x32xf32>
    %c0_3 = arith.constant 0 : index
    %c0_4 = arith.constant 0 : index
    %2 = vector.load %arg5[%c0_3, %c0_4] : memref<8x8xf32, #tpu.memory_space<vmem>>, vector<8x8xf32>
    %c0_5 = arith.constant 0 : index
    %c0_6 = arith.constant 0 : index
    %c0_7 = arith.constant 0 : index
    %3 = vector.load %arg4[%c0_5, %c0_6, %c0_7] : memref<8x8x32xf32, #tpu.memory_space<vmem>>, vector<8x8x32xf32>
    %4 = vector.shape_cast %3 : vector<8x8x32xf32> to vector<64x32xf32>
    %c0_8 = arith.constant 0 : index
    %c0_9 = arith.constant 0 : index
    %5 = vector.load %arg6[%c0_8, %c0_9] : memref<32x64xf32, #tpu.memory_space<vmem>>, vector<32x64xf32>
    %cst = arith.constant dense<0.000000e+00> : vector<64x64xf32>
    %6 = tpu.matmul %4, %5, %cst {dimension_numbers = #tpu.dot_dimension_numbers<[1], [0], [0], [1], [0, 0, 1, 1], [], []>, precision = #tpu.contract_precision<fp32>} : vector<64x32xf32>, vector<32x64xf32>, vector<64x64xf32> -> vector<64x64xf32>
    %7 = vector.shape_cast %6 : vector<64x64xf32> to vector<8x8x64xf32>
    %c0_10 = arith.constant 0 : index
    %c0_11 = arith.constant 0 : index
    %8 = vector.load %arg3[%c0_10, %c0_11] : memref<8x64xf32, #tpu.memory_space<vmem>>, vector<8x64xf32>
    %9 = vector.shape_cast %8 : vector<8x64xf32> to vector<1x8x64xf32>
    %10 = vector.broadcast %9 : vector<1x8x64xf32> to vector<8x8x64xf32>
    %11 = arith.addf %10, %7 : vector<8x8x64xf32>
    %cst_12 = arith.constant 2.000000e-01 : f32
    %12 = vector.broadcast %cst_12 : f32 to vector<8x8x64xf32>
    %13 = arith.mulf %12, %11 : vector<8x8x64xf32>
    %14 = arith.maximumf %11, %13 : vector<8x8x64xf32>
    %cst_13 = arith.constant 1.000000e+00 : f32
    %15 = vector.broadcast %cst_13 : f32 to vector<8x8xf32>
    %16 = arith.cmpf oeq, %2, %15 : vector<8x8xf32>
    %cst_14 = arith.constant 0.000000e+00 : f32
    %cst_15 = arith.constant -3.40282347E+38 : f32
    %17 = vector.broadcast %cst_14 : f32 to vector<8x8xf32>
    %18 = vector.broadcast %cst_15 : f32 to vector<8x8xf32>
    %19 = arith.select %16, %17, %18 : vector<8x8xi1>, vector<8x8xf32>
    %c0_16 = arith.constant 0 : index
    %c0_17 = arith.constant 0 : index
    %20 = vector.load %arg10[%c0_16, %c0_17] : memref<32x32xf32, #tpu.memory_space<vmem>>, vector<32x32xf32>
    %cst_18 = arith.constant dense<0.000000e+00> : vector<8x32xf32>
    %21 = tpu.matmul %1, %20, %cst_18 {dimension_numbers = #tpu.dot_dimension_numbers<[1], [0], [0], [1], [0, 0, 1, 1], [], []>, precision = #tpu.contract_precision<fp32>} : vector<8x32xf32>, vector<32x32xf32>, vector<8x32xf32> -> vector<8x32xf32>
    %c0_19 = arith.constant 0 : index
    %c0_20 = arith.constant 0 : index
    %22 = vector.load %arg12[%c0_19, %c0_20] : memref<1x32xf32, #tpu.memory_space<vmem>>, vector<1x32xf32>
    %23 = vector.broadcast %22 : vector<1x32xf32> to vector<8x32xf32>
    %24 = arith.addf %21, %23 : vector<8x32xf32>
    %25 = vector.extract_strided_slice %14 {offsets = [0, 0, 0], sizes = [8, 8, 32], strides = [1, 1, 1]} : vector<8x8x64xf32> to vector<8x8x32xf32>
    %c0_21 = arith.constant 0 : index
    %c0_22 = arith.constant 0 : index
    %c0_23 = arith.constant 0 : index
    %26 = vector.load %arg8[%c0_21, %c0_22, %c0_23] : memref<2x1x32xf32, #tpu.memory_space<vmem>>, vector<1x1x32xf32>
    %27 = vector.shape_cast %26 : vector<1x1x32xf32> to vector<1x32xf32>
    %28 = vector.shape_cast %27 : vector<1x32xf32> to vector<1x1x32xf32>
    %29 = vector.broadcast %28 : vector<1x1x32xf32> to vector<8x8x32xf32>
    %30 = arith.mulf %25, %29 : vector<8x8x32xf32>
    %cst_24 = arith.constant dense<0.000000e+00> : vector<8x8xf32>
    %31 = vector.multi_reduction <add>, %30, %cst_24 [2] : vector<8x8x32xf32> to vector<8x8xf32>
    %c0_25 = arith.constant 0 : index
    %c0_26 = arith.constant 0 : index
    %c0_27 = arith.constant 0 : index
    %32 = vector.load %arg7[%c0_25, %c0_26, %c0_27] : memref<2x1x32xf32, #tpu.memory_space<vmem>>, vector<1x1x32xf32>
    %33 = vector.shape_cast %32 : vector<1x1x32xf32> to vector<1x32xf32>
    %34 = vector.broadcast %33 : vector<1x32xf32> to vector<8x32xf32>
    %35 = arith.mulf %1, %34 : vector<8x32xf32>
    %cst_28 = arith.constant dense<0.000000e+00> : vector<8xf32>
    %36 = vector.multi_reduction <add>, %35, %cst_28 [1] : vector<8x32xf32> to vector<8xf32>
    %37 = vector.shape_cast %36 : vector<8xf32> to vector<8x1xf32>
    %38 = vector.broadcast %37 : vector<8x1xf32> to vector<8x8xf32>
    %39 = arith.addf %38, %31 : vector<8x8xf32>
    %c0_29 = arith.constant 0 : index
    %40 = memref.load %arg9[%c0_29] : memref<2xf32, #tpu.memory_space<smem>>
    %41 = vector.broadcast %40 : f32 to vector<8x8xf32>
    %42 = arith.addf %39, %41 : vector<8x8xf32>
    %cst_30 = arith.constant 2.000000e-01 : f32
    %43 = vector.broadcast %cst_30 : f32 to vector<8x8xf32>
    %44 = arith.mulf %43, %42 : vector<8x8xf32>
    %45 = arith.maximumf %42, %44 : vector<8x8xf32>
    %46 = arith.addf %45, %19 : vector<8x8xf32>
    %cst_31 = arith.constant dense<0xFF800000> : vector<8xf32>
    %47 = vector.multi_reduction <maximumf>, %46, %cst_31 [1] : vector<8x8xf32> to vector<8xf32>
    %48 = vector.shape_cast %47 : vector<8xf32> to vector<8x1xf32>
    %49 = vector.broadcast %48 : vector<8x1xf32> to vector<8x8xf32>
    %50 = arith.subf %46, %49 : vector<8x8xf32>
    %51 = math.exp %50 : vector<8x8xf32>
    %cst_32 = arith.constant dense<0.000000e+00> : vector<8xf32>
    %52 = vector.multi_reduction <add>, %51, %cst_32 [1] : vector<8x8xf32> to vector<8xf32>
    %53 = vector.shape_cast %52 : vector<8xf32> to vector<8x1xf32>
    %54 = vector.broadcast %53 : vector<8x1xf32> to vector<8x8xf32>
    %55 = arith.divf %51, %54 : vector<8x8xf32>
    %cst_33 = arith.constant dense<0.000000e+00> : vector<8x32xf32>
    %56 = tpu.matmul %55, %0, %cst_33 {dimension_numbers = #tpu.dot_dimension_numbers<[1], [0], [0], [1], [0, 0, 1, 1], [], []>, precision = #tpu.contract_precision<fp32>} : vector<8x8xf32>, vector<8x32xf32>, vector<8x32xf32> -> vector<8x32xf32>
    %57 = vector.extract_strided_slice %14 {offsets = [0, 0, 32], sizes = [8, 8, 32], strides = [1, 1, 1]} : vector<8x8x64xf32> to vector<8x8x32xf32>
    %c1 = arith.constant 1 : index
    %c0_34 = arith.constant 0 : index
    %c0_35 = arith.constant 0 : index
    %58 = vector.load %arg8[%c1, %c0_34, %c0_35] : memref<2x1x32xf32, #tpu.memory_space<vmem>>, vector<1x1x32xf32>
    %59 = vector.shape_cast %58 : vector<1x1x32xf32> to vector<1x32xf32>
    %60 = vector.shape_cast %59 : vector<1x32xf32> to vector<1x1x32xf32>
    %61 = vector.broadcast %60 : vector<1x1x32xf32> to vector<8x8x32xf32>
    %62 = arith.mulf %57, %61 : vector<8x8x32xf32>
    %cst_36 = arith.constant dense<0.000000e+00> : vector<8x8xf32>
    %63 = vector.multi_reduction <add>, %62, %cst_36 [2] : vector<8x8x32xf32> to vector<8x8xf32>
    %c1_37 = arith.constant 1 : index
    %c0_38 = arith.constant 0 : index
    %c0_39 = arith.constant 0 : index
    %64 = vector.load %arg7[%c1_37, %c0_38, %c0_39] : memref<2x1x32xf32, #tpu.memory_space<vmem>>, vector<1x1x32xf32>
    %65 = vector.shape_cast %64 : vector<1x1x32xf32> to vector<1x32xf32>
    %66 = vector.broadcast %65 : vector<1x32xf32> to vector<8x32xf32>
    %67 = arith.mulf %1, %66 : vector<8x32xf32>
    %cst_40 = arith.constant dense<0.000000e+00> : vector<8xf32>
    %68 = vector.multi_reduction <add>, %67, %cst_40 [1] : vector<8x32xf32> to vector<8xf32>
    %69 = vector.shape_cast %68 : vector<8xf32> to vector<8x1xf32>
    %70 = vector.broadcast %69 : vector<8x1xf32> to vector<8x8xf32>
    %71 = arith.addf %70, %63 : vector<8x8xf32>
    %c1_41 = arith.constant 1 : index
    %72 = memref.load %arg9[%c1_41] : memref<2xf32, #tpu.memory_space<smem>>
    %73 = vector.broadcast %72 : f32 to vector<8x8xf32>
    %74 = arith.addf %71, %73 : vector<8x8xf32>
    %cst_42 = arith.constant 2.000000e-01 : f32
    %75 = vector.broadcast %cst_42 : f32 to vector<8x8xf32>
    %76 = arith.mulf %75, %74 : vector<8x8xf32>
    %77 = arith.maximumf %74, %76 : vector<8x8xf32>
    %78 = arith.addf %77, %19 : vector<8x8xf32>
    %cst_43 = arith.constant dense<0xFF800000> : vector<8xf32>
    %79 = vector.multi_reduction <maximumf>, %78, %cst_43 [1] : vector<8x8xf32> to vector<8xf32>
    %80 = vector.shape_cast %79 : vector<8xf32> to vector<8x1xf32>
    %81 = vector.broadcast %80 : vector<8x1xf32> to vector<8x8xf32>
    %82 = arith.subf %78, %81 : vector<8x8xf32>
    %83 = math.exp %82 : vector<8x8xf32>
    %cst_44 = arith.constant dense<0.000000e+00> : vector<8xf32>
    %84 = vector.multi_reduction <add>, %83, %cst_44 [1] : vector<8x8xf32> to vector<8xf32>
    %85 = vector.shape_cast %84 : vector<8xf32> to vector<8x1xf32>
    %86 = vector.broadcast %85 : vector<8x1xf32> to vector<8x8xf32>
    %87 = arith.divf %83, %86 : vector<8x8xf32>
    %cst_45 = arith.constant dense<0.000000e+00> : vector<8x32xf32>
    %88 = tpu.matmul %87, %0, %cst_45 {dimension_numbers = #tpu.dot_dimension_numbers<[1], [0], [0], [1], [0, 0, 1, 1], [], []>, precision = #tpu.contract_precision<fp32>} : vector<8x8xf32>, vector<8x32xf32>, vector<8x32xf32> -> vector<8x32xf32>
    %89 = tpu.concatenate %56, %88 in 1 : vector<8x32xf32>, vector<8x32xf32> -> vector<8x64xf32>
    %c0_46 = arith.constant 0 : index
    %c0_47 = arith.constant 0 : index
    %90 = vector.load %arg11[%c0_46, %c0_47] : memref<64x32xf32, #tpu.memory_space<vmem>>, vector<64x32xf32>
    %cst_48 = arith.constant dense<0.000000e+00> : vector<8x32xf32>
    %91 = tpu.matmul %89, %90, %cst_48 {dimension_numbers = #tpu.dot_dimension_numbers<[1], [0], [0], [1], [0, 0, 1, 1], [], []>, precision = #tpu.contract_precision<fp32>} : vector<8x64xf32>, vector<64x32xf32>, vector<8x32xf32> -> vector<8x32xf32>
    %92 = arith.addf %24, %91 : vector<8x32xf32>
    %c0_49 = arith.constant 0 : index
    %c0_50 = arith.constant 0 : index
    %93 = vector.load %arg13[%c0_49, %c0_50] : memref<8x32xf32, #tpu.memory_space<vmem>>, vector<8x32xf32>
    tpu.vector_store %arg13[%c0_49, %c0_50], %92 {strides = array<i32>} : memref<8x32xf32, #tpu.memory_space<vmem>>, vector<8x32xf32>,
    return
  }
  func.func @transform_0(%arg0: i32) -> (i32, i32) {
    %c0_i32 = arith.constant 0 : i32
    %c0_i32_0 = arith.constant 0 : i32
    %c0_i32_1 = arith.constant 0 : i32
    return %c0_i32, %c0_i32_0 : i32, i32
  }
  func.func @transform_1(%arg0: i32) -> (i32, i32) {
    %c0_i32 = arith.constant 0 : i32
    %c0_i32_0 = arith.constant 0 : i32
    return %arg0, %c0_i32 : i32, i32
  }
  func.func @transform_2(%arg0: i32) -> (i32, i32) {
    %c0_i32 = arith.constant 0 : i32
    %c0_i32_0 = arith.constant 0 : i32
    %c0_i32_1 = arith.constant 0 : i32
    return %c0_i32, %c0_i32_0 : i32, i32
  }
  func.func @transform_3(%arg0: i32) -> (i32, i32, i32) {
    %c0_i32 = arith.constant 0 : i32
    %c0_i32_0 = arith.constant 0 : i32
    %c0_i32_1 = arith.constant 0 : i32
    return %arg0, %c0_i32, %c0_i32_0 : i32, i32, i32
  }
  func.func @transform_4(%arg0: i32) -> (i32, i32) {
    %c0_i32 = arith.constant 0 : i32
    %c0_i32_0 = arith.constant 0 : i32
    return %arg0, %c0_i32 : i32, i32
  }
  func.func @transform_5(%arg0: i32) -> (i32, i32) {
    %c0_i32 = arith.constant 0 : i32
    %c0_i32_0 = arith.constant 0 : i32
    %c0_i32_1 = arith.constant 0 : i32
    return %c0_i32, %c0_i32_0 : i32, i32
  }
  func.func @transform_6(%arg0: i32) -> (i32, i32, i32) {
    %c0_i32 = arith.constant 0 : i32
    %c0_i32_0 = arith.constant 0 : i32
    %c0_i32_1 = arith.constant 0 : i32
    %c0_i32_2 = arith.constant 0 : i32
    return %c0_i32, %c0_i32_0, %c0_i32_1 : i32, i32, i32
  }
  func.func @transform_7(%arg0: i32) -> (i32, i32, i32) {
    %c0_i32 = arith.constant 0 : i32
    %c0_i32_0 = arith.constant 0 : i32
    %c0_i32_1 = arith.constant 0 : i32
    %c0_i32_2 = arith.constant 0 : i32
    return %c0_i32, %c0_i32_0, %c0_i32_1 : i32, i32, i32
  }
  func.func @transform_8(%arg0: i32) -> i32 {
    %c0_i32 = arith.constant 0 : i32
    %c0_i32_0 = arith.constant 0 : i32
    return %c0_i32 : i32
  }
  func.func @transform_9(%arg0: i32) -> (i32, i32) {
    %c0_i32 = arith.constant 0 : i32
    %c0_i32_0 = arith.constant 0 : i32
    %c0_i32_1 = arith.constant 0 : i32
    return %c0_i32, %c0_i32_0 : i32, i32
  }
  func.func @transform_10(%arg0: i32) -> (i32, i32) {
    %c0_i32 = arith.constant 0 : i32
    %c0_i32_0 = arith.constant 0 : i32
    %c0_i32_1 = arith.constant 0 : i32
    return %c0_i32, %c0_i32_0 : i32, i32
  }
  func.func @transform_11(%arg0: i32) -> (i32, i32) {
    %c0_i32 = arith.constant 0 : i32
    %c0_i32_0 = arith.constant 0 : i32
    %c0_i32_1 = arith.constant 0 : i32
    return %c0_i32, %c0_i32_0 : i32, i32
  }
  func.func @transform_12(%arg0: i32) -> (i32, i32) {
    %c0_i32 = arith.constant 0 : i32
    %c0_i32_0 = arith.constant 0 : i32
    return %arg0, %c0_i32 : i32, i32
  }
}

</mosaic_0001>

<bundles_post_ra>
// kernel: mhag_forward.1
= control target key start
LH: loop header
LB: loop body
LE: loop exit
PB: predicated region body
PF: predicated region fallthrough
CT: control target
= control target key end

     0   :  { %17 = vsyncpa [#allocation4], 0  ;;  %s2058_s0 = inlined_call_operand.vmem [shape: f32[8,32], index: 0, kind: input, shape index: {}, may-alias: {0,1}]   ;;  %s2059_s1 = inlined_call_operand.vmem [shape: f32[8,32], index: 1, kind: input, shape index: {}, may-alias: {0,1}]   ;;  %s2060_s2 = inlined_call_operand.vmem [shape: f32[8,64], index: 2, kind: input, shape index: {}]   ;;  %s2061_s3 = inlined_call_operand.vmem [shape: f32[8,8,32], index: 3, kind: input, shape index: {}]   ;;  %s2062_s4 = inlined_call_operand.vmem [shape: f32[8,8], index: 4, kind: input, shape index: {}]   ;;  %s2063_s5 = inlined_call_operand.vmem [shape: f32[32,64], index: 5, kind: input, shape index: {}]   ;;  %s2064_s6 = inlined_call_operand.vmem [shape: f32[2,1,32], index: 6, kind: input, shape index: {}]   ;;  %s2065_s7 = inlined_call_operand.vmem [shape: f32[2,1,32], index: 7, kind: input, shape index: {}]   ;;  %s2066_s8 = inlined_call_operand.vmem [shape: f32[2], index: 8, kind: input, shape index: {}]   ;;  %s2067_s9 = inlined_call_operand.vmem [shape: f32[32,32], index: 9, kind: input, shape index: {}]   ;;  %s2068_s10 = inlined_call_operand.vmem [shape: f32[64,32], index: 10, kind: input, shape index: {}]   ;;  %s2069_s11 = inlined_call_operand.vmem [shape: f32[1,32], index: 11, kind: input, shape index: {}]   ;;  %s2070_s12 = inlined_call_operand.hbm [shape: f32[8,32], index: 12, kind: output, shape index: {}]  }
   0x1   :  { %18 = vsyncpa [#allocation3], 0  ;;  %s40_s23 = sshll.u32 %s2066_s8, 4  ;;  %s1596_s24 = smov [#allocation2]   ;;  %s41_s23 = int_to_ptr.vmem [resolvable:$true] %s40_s23 }
   0x2   :  { %43 = dma.vmem_to_smem %s41_s23, 16, %s1596_s24, [#allocation4]  }
   0x3   :  { %1592 = dma.done.wait [#allocation4], 16  }
   0x4   :  { %1593 = vsyncadd [#allocation4], 4294967280 }
   0x5   :  { %54 = sfence }
   0x6   :  { %v69_v0 = vld [vmem:[%s2063_s5 + $0x18] sm:$0xff]  ;;  %v68_v1 = vld [vmem:[%s2063_s5 + $0x10] sm:$0xff]  ;;  %v67_v2 = vld [vmem:[%s2063_s5 + $0x8] sm:$0xff]  ;;  %vm70_vm0 = vcmask 261120   ;;  %s1597_s30 = smov 32   ;;  %vm782_vm1 = vcmask 1041409  }
   0x7   :  { %v1678_v3 = vand.u32 4294901760, %v69_v0  ;;  %v1680_v4 = vand.u32 4294901760, %v68_v1  ;;  %v1682_v5 = vand.u32 4294901760, %v67_v2  ;;  %v66_v6 = vld [vmem:[%s2063_s5] sm:$0xff]  ;;  %v59_v8 = vld [vmem:[%s2061_s3 + $0x8] sm:$0xff]  ;;  %v60_v12 = vld [vmem:[%s2061_s3 + $0x10] sm:$0xff] }
   0x8   :  { %v58_v7 = vld [vmem:[%s2061_s3] sm:$0xff]  ;;  %v1693_v9 = vand.u32 4294901760, %v66_v6  ;;  %v75_v11 = vsel %vm70_vm0, %v59_v8, 0  ;;  %v78_v19 = vsel %vm70_vm0, %v60_v12, 0  ;;  %v61_v38 = vld [vmem:[%s2061_s3 + $0x18] sm:$0xff]  ;;  %v63_v53 = vld [vmem:[%s2061_s3 + $0x28] sm:$0xff] }
   0x9   :  { %v72_v10 = vsel %vm70_vm0, %v58_v7, 0  ;;  %108 = vmatpush.msra.mxu0 %v1678_v3  ;;  %v193_v13 = vsub.f32 %v69_v0, %v1678_v3  ;;  %v199_v14 = vsub.f32 %v68_v1, %v1680_v4  ;;  %327 = vmatpush.msra.mxu3 %v1678_v3  ;;  %v205_v15 = vsub.f32 %v67_v2, %v1682_v5  ;;  %v62_v46 = vld [vmem:[%s2061_s3 + $0x20] sm:$0xff]  ;;  %v64_v60 = vld [vmem:[%s2061_s3 + $0x30] sm:$0xff]  ;;  %s798_s5 = sld [smem:[#allocation2]]  ;;  %s1525_s23 = sshll.u32 %s2070_s12, 4  ;;  %s1526_s23 = int_to_ptr.hbm [resolvable:$true] %s1525_s23 }
   0xa   :  { %v1705_v16 = vand.u32 4294901760, %v72_v10  ;;  %v211_v17 = vsub.f32 %v66_v6, %v1693_v9  ;;  %v1708_v18 = vand.u32 4294901760, %v75_v11  ;;  %v1717_v31 = vand.u32 4294901760, %v78_v19 }
   0xb   :  { %110 = vmatpush.msra.mxu0 %v1680_v4  ;;  %263 = vmatpush.msra.mxu2 %v193_v13  ;;  %v194_v20 = vand.u32 4294901760, %v193_v13  ;;  %v200_v22 = vand.u32 4294901760, %v199_v14  ;;  %v206_v23 = vand.u32 4294901760, %v205_v15  ;;  %v81_v42 = vsel %vm70_vm0, %v61_v38, 0 }
   0xc   :  { %v116_v21 = vsub.f32 %v72_v10, %v1705_v16  ;;  %329 = vmatpush.msra.mxu3 %v1680_v4  ;;  %v212_v24 = vand.u32 4294901760, %v211_v17  ;;  %v124_v25 = vsub.f32 %v75_v11, %v1708_v18  ;;  %v132_v41 = vsub.f32 %v78_v19, %v1717_v31 }
   0xd   :  { %112 = vmatpush.msra.mxu0 %v1682_v5  ;;  %266 = vmatpush.msra.mxu2 %v199_v14  ;;  %v195_v26 = vsub.f32 %v193_v13, %v194_v20  ;;  %v201_v28 = vsub.f32 %v199_v14, %v200_v22  ;;  %v207_v29 = vsub.f32 %v205_v15, %v206_v23  ;;  %v1726_v45 = vand.u32 4294901760, %v81_v42 }
   0xe   :  { %v117_v27 = vand.u32 4294901760, %v116_v21  ;;  %331 = vmatpush.msra.mxu3 %v1682_v5  ;;  %v213_v30 = vsub.f32 %v211_v17, %v212_v24  ;;  %v125_v35 = vand.u32 4294901760, %v124_v25  ;;  %v133_v44 = vand.u32 4294901760, %v132_v41 }
   0xf   :  { %114 = vmatpush.msra.mxu0 %v1693_v9  ;;  %v196_v32 = vand.u32 4294901760, %v195_v26  ;;  %269 = vmatpush.msra.mxu2 %v205_v15  ;;  %v202_v34 = vand.u32 4294901760, %v201_v28  ;;  %v208_v37 = vand.u32 4294901760, %v207_v29  ;;  %v140_v48 = vsub.f32 %v81_v42, %v1726_v45 }
  0x10   :  { %v118_v33 = vsub.f32 %v116_v21, %v117_v27  ;;  %333 = vmatpush.msra.mxu3 %v1693_v9  ;;  %v214_v39 = vand.u32 4294901760, %v213_v30  ;;  %v126_v40 = vsub.f32 %v124_v25, %v125_v35  ;;  %v134_v47 = vsub.f32 %v132_v41, %v133_v44 }
  0x11   :  { %398 = vmatpush.msrb.mxu0 %v194_v20  ;;  %197 = vmatpush.msra.mxu1 %v196_v32  ;;  %v84_v49 = vsel %vm70_vm0, %v62_v46, 0  ;;  %v141_v51 = vand.u32 4294901760, %v140_v48  ;;  %v87_v56 = vsel %vm70_vm0, %v63_v53, 0  ;;  %v90_v63 = vsel %vm70_vm0, %v64_v60, 0 }
  0x12   :  { %v119_v36 = vand.u32 4294901760, %v118_v33  ;;  %272 = vmatpush.msra.mxu2 %v211_v17  ;;  %337 = vmatmul.f32.vlgmr.msra.gmra.mxu3 %v117_v27  ;;  %v127_v43 = vand.u32 4294901760, %v126_v40  ;;  %v135_v50 = vand.u32 4294901760, %v134_v47  ;;  %v1737_v52 = vand.u32 4294901760, %v84_v49  ;;  %v1543_v17 = vld [vmem:[%s2065_s7 + $0x1] ss:$0 sm:$0xff] }
  0x13   :  { %275 = vmatmul.f32.vlgmr.msra.gmra.mxu2 %v116_v21  ;;  %203 = vmatpush.msra.mxu1 %v202_v34  ;;  %v142_v54 = vsub.f32 %v140_v48, %v141_v51  ;;  %v155_v59 = vand.u32 4294901760, %v87_v56  ;;  %v163_v2 = vand.u32 4294901760, %v90_v63  ;;  %vm784_vm2 = vcmask 1042434  }
  0x14   :  { %120 = vmatmul.f32.vlgmr.msra.gmra.mxu0 %v119_v36  ;;  %v148_v55 = vsub.f32 %v84_v49, %v1737_v52  ;;  %982 = vrot.lane.b32.xlu0 %v1543_v17, %s1597_s30  ;;  %vm786_vm3 = vcmask 1043459   ;;  %vm788_vm4 = vcmask 1044484   ;;  %vm790_vm5 = vcmask 1045509  }
  0x15   :  { %402 = vmatpush.msrb.mxu0 %v200_v22  ;;  %209 = vmatpush.msra.mxu1 %v208_v37  ;;  %v143_v57 = vand.u32 4294901760, %v142_v54  ;;  %v156_v62 = vsub.f32 %v87_v56, %v155_v59  ;;  %vm792_vm6 = vcmask 1046534   ;;  %vm794_vm7 = vcmask 1047559  }
  0x16   :  { %v149_v58 = vand.u32 4294901760, %v148_v55  ;;  %vm804_vm9 = vcmask 64512  }
  0x17   :  { %406 = vmatpush.msrb.mxu0 %v206_v23  ;;  %215 = vmatpush.msra.mxu1 %v214_v39  ;;  %v157_v1 = vand.u32 4294901760, %v156_v62 }
  0x18   :  { %217 = vmatmul.f32.vlgmr.msra.gmra.mxu1 %v1705_v16  ;;  %v150_v61 = vsub.f32 %v148_v55, %v149_v58 }
  0x19   :  { %410 = vmatpush.msrb.mxu0 %v212_v24  ;;  %457 = vmatpush.msrb.mxu1 %v1678_v3  ;;  %v65_v3 = vld [vmem:[%s2061_s3 + $0x38] sm:$0xff] }
  0x1a   :  { %343 = vmatmul.f32.gmra.mxu3 %v125_v35  ;;  %v151_v0 = vand.u32 4294901760, %v150_v61  ;;  %v93_v6 = vsel %vm70_vm0, %v65_v3, 0 }
  0x1b   :  { %280 = vmatmul.f32.gmra.mxu2 %v124_v25  ;;  %459 = vmatpush.msrb.mxu1 %v1680_v4  ;;  %v158_v4 = vsub.f32 %v156_v62, %v157_v1 }
  0x1c   :  { %128 = vmatmul.f32.gmra.mxu0 %v127_v43 }
  0x1d   :  { %461 = vmatpush.msrb.mxu1 %v1682_v5  ;;  %v164_v5 = vsub.f32 %v90_v63, %v163_v2  ;;  %v159_v7 = vand.u32 4294901760, %v158_v4 }
  0x1f   :  { %463 = vmatpush.msrb.mxu1 %v1693_v9  ;;  %v165_v8 = vand.u32 4294901760, %v164_v5  ;;  %v171_v9 = vand.u32 4294901760, %v93_v6 }
  0x20   :  { %221 = vmatmul.f32.gmra.mxu1 %v1708_v18 }
  0x21   :  { %v166_v10 = vsub.f32 %v164_v5, %v165_v8  ;;  %v172_v11 = vsub.f32 %v93_v6, %v171_v9 }
  0x22   :  { %349 = vmatmul.f32.gmra.mxu3 %v133_v44 }
  0x23   :  { %285 = vmatmul.f32.gmra.mxu2 %v132_v41  ;;  %v167_v12 = vand.u32 4294901760, %v166_v10  ;;  %v173_v13 = vand.u32 4294901760, %v172_v11 }
  0x24   :  { %136 = vmatmul.f32.gmra.mxu0 %v135_v50 }
  0x25   :  { %v174_v14 = vsub.f32 %v172_v11, %v173_v13 }
  0x27   :  { %v175_v15 = vand.u32 4294901760, %v174_v14 }
  0x28   :  { %225 = vmatmul.f32.gmra.mxu1 %v1717_v31 }
  0x2a   :  { %355 = vmatmul.f32.gmra.mxu3 %v141_v51  ;;  %v1782_v51 = vld [vmem:[%s2060_s2] sm:$0xff]  ;;  %s1598_s2 = smov 96  }
  0x2b   :  { %290 = vmatmul.f32.gmra.mxu2 %v140_v48 }
  0x2c   :  { %144 = vmatmul.f32.gmra.mxu0 %v143_v57 }
  0x30   :  { %229 = vmatmul.f32.gmra.mxu1 %v1726_v45 }
  0x32   :  { %361 = vmatmul.f32.gmra.mxu3 %v149_v58 }
  0x33   :  { %295 = vmatmul.f32.gmra.mxu2 %v148_v55 }
  0x34   :  { %152 = vmatmul.f32.gmra.mxu0 %v151_v0 }
  0x38   :  { %233 = vmatmul.f32.gmra.mxu1 %v1737_v52 }
  0x3a   :  { %367 = vmatmul.f32.gmra.mxu3 %v157_v1 }
  0x3b   :  { %300 = vmatmul.f32.gmra.mxu2 %v156_v62 }
  0x3c   :  { %160 = vmatmul.f32.gmra.mxu0 %v159_v7 }
  0x40   :  { %237 = vmatmul.f32.gmra.mxu1 %v155_v59 }
  0x42   :  { %373 = vmatmul.f32.gmra.mxu3 %v165_v8 }
  0x43   :  { %305 = vmatmul.f32.gmra.mxu2 %v164_v5 }
  0x44   :  { %168 = vmatmul.f32.gmra.mxu0 %v167_v12 }
  0x48   :  { %241 = vmatmul.f32.gmra.mxu1 %v163_v2 }
  0x4a   :  { %379 = vmatmul.f32.gmra.mxu3 %v173_v13 }
  0x4b   :  { %310 = vmatmul.f32.gmra.mxu2 %v172_v11 }
  0x4c   :  { %176 = vmatmul.f32.gmra.mxu0 %v175_v15 }
  0x50   :  { %245 = vmatmul.f32.gmra.mxu1 %v171_v9 }
  0x54   :  { %412 = vmatmul.f32.vlgmr.msrb.gmra.mxu0 %v1705_v16 }
  0x58   :  { %465 = vmatmul.f32.vlgmr.msrb.gmra.mxu1 %v1705_v16 }
  0x5c   :  { %416 = vmatmul.f32.gmra.mxu0 %v1708_v18 }
  0x60   :  { %469 = vmatmul.f32.gmra.mxu1 %v1708_v18 }
  0x64   :  { %420 = vmatmul.f32.gmra.mxu0 %v1717_v31 }
  0x68   :  { %473 = vmatmul.f32.gmra.mxu1 %v1717_v31 }
  0x6c   :  { %424 = vmatmul.f32.gmra.mxu0 %v1726_v45 }
  0x70   :  { %477 = vmatmul.f32.gmra.mxu1 %v1726_v45 }
  0x74   :  { %428 = vmatmul.f32.gmra.mxu0 %v1737_v52 }
  0x78   :  { %481 = vmatmul.f32.gmra.mxu1 %v1737_v52 }
  0x7c   :  { %432 = vmatmul.f32.gmra.mxu0 %v155_v59 }
  0x80   :  { %485 = vmatmul.f32.gmra.mxu1 %v155_v59 }
  0x84   :  { %436 = vmatmul.f32.gmra.mxu0 %v163_v2 }
  0x86   :  { %v1785_v60 = vpop.permute.xlu0 %982 }
  0x88   :  { %489 = vmatmul.f32.gmra.mxu1 %v163_v2 }
  0x8c   :  { %440 = vmatmul.f32.gmra.mxu0 %v171_v9 }
  0x90   :  { %493 = vmatmul.f32.gmra.mxu1 %v171_v9 }
  0x91   :  { %v121_v16 = vpop.f32.mrf.mxu0 }
  0x95   :  { %v218_v18 = vpop.f32.mrf.mxu1  ;;  %v338_v34 = vpop.f32.mrf.mxu3 }
  0x96   :  { %v276_v30 = vpop.f32.mrf.mxu2  ;;  %v219_v39 = vadd.f32 %v218_v18, %v121_v16 }
  0x98   :  { %v277_v42 = vadd.f32 %v276_v30, %v219_v39 }
  0x99   :  { %v129_v19 = vpop.f32.mrf.mxu0 }
  0x9a   :  { %v339_v46 = vadd.f32 %v338_v34, %v277_v42 }
  0x9d   :  { %v222_v20 = vpop.f32.mrf.mxu1  ;;  %v344_v40 = vpop.f32.mrf.mxu3 }
  0x9e   :  { %v281_v37 = vpop.f32.mrf.mxu2  ;;  %v223_v47 = vadd.f32 %v222_v20, %v129_v19 }
  0xa0   :  { %v282_v52 = vadd.f32 %v281_v37, %v223_v47 }
  0xa1   :  { %v137_v21 = vpop.f32.mrf.mxu0 }
  0xa2   :  { %v345_v56 = vadd.f32 %v344_v40, %v282_v52 }
  0xa5   :  { %v226_v22 = vpop.f32.mrf.mxu1  ;;  %v350_v49 = vpop.f32.mrf.mxu3 }
  0xa6   :  { %v286_v45 = vpop.f32.mrf.mxu2  ;;  %v227_v57 = vadd.f32 %v226_v22, %v137_v21  ;;  %v1804_v22 = vld [vmem:[%s2065_s7] ss:$0 sm:$0xff] }
  0xa8   :  { %v287_v0 = vadd.f32 %v286_v45, %v227_v57 }
  0xa9   :  { %v145_v23 = vpop.f32.mrf.mxu0 }
  0xaa   :  { %v351_v6 = vadd.f32 %v350_v49, %v287_v0 }
  0xad   :  { %v230_v24 = vpop.f32.mrf.mxu1  ;;  %v356_v3 = vpop.f32.mrf.mxu3 }
  0xae   :  { %v231_v25 = vadd.f32 %v230_v24, %v145_v23  ;;  %v291_v59 = vpop.f32.mrf.mxu2 }
  0xb0   :  { %v292_v12 = vadd.f32 %v291_v59, %v231_v25 }
  0xb1   :  { %v153_v26 = vpop.f32.mrf.mxu0 }
  0xb2   :  { %v357_v18 = vadd.f32 %v356_v3, %v292_v12 }
  0xb5   :  { %v234_v27 = vpop.f32.mrf.mxu1  ;;  %v362_v16 = vpop.f32.mrf.mxu3 }
  0xb6   :  { %v1771_v28 = vadd.f32 %v234_v27, %v153_v26  ;;  %v296_v10 = vpop.f32.mrf.mxu2 }
  0xb9   :  { %v161_v29 = vpop.f32.mrf.mxu0 }
  0xbd   :  { %v238_v31 = vpop.f32.mrf.mxu1 }
  0xbe   :  { %v1773_v32 = vadd.f32 %v238_v31, %v161_v29  ;;  %v301_v26 = vpop.f32.mrf.mxu2 }
  0xc1   :  { %v169_v33 = vpop.f32.mrf.mxu0 }
  0xc5   :  { %v242_v35 = vpop.f32.mrf.mxu1 }
  0xc6   :  { %v1775_v36 = vadd.f32 %v242_v35, %v169_v33  ;;  %v368_v33 = vpop.f32.mrf.mxu3  ;;  %v297_v35 = vadd.f32 %v296_v10, %v1771_v28  ;;  %v306_v42 = vpop.f32.mrf.mxu2 }
  0xc9   :  { %v177_v38 = vpop.f32.mrf.mxu0 }
  0xcd   :  { %v246_v41 = vpop.f32.mrf.mxu1 }
  0xce   :  { %v1777_v43 = vadd.f32 %v246_v41, %v177_v38  ;;  %v302_v38 = vadd.f32 %v301_v26, %v1773_v32  ;;  %v363_v41 = vadd.f32 %v362_v16, %v297_v35  ;;  %v374_v47 = vpop.f32.mrf.mxu3 }
  0xd1   :  { %v413_v44 = vpop.f32.mrf.mxu0 }
  0xd2   :  { %v414_v48 = vadd.f32 %v413_v44, %v339_v46  ;;  %v369_v44 = vadd.f32 %v368_v33, %v302_v38  ;;  %v772_v33 = vlaneseq }
  0xd5   :  { %v466_v50 = vpop.f32.mrf.mxu1 }
  0xd6   :  { %v467_v53 = vadd.f32 %v466_v50, %v414_v48  ;;  %v307_v50 = vadd.f32 %v306_v42, %v1775_v36 }
  0xd8   :  { %v498_v54 = vadd.f32 %v1782_v51, %v467_v53  ;;  %v375_v32 = vadd.f32 %v374_v47, %v307_v50  ;;  %v1861_v47 = vld [vmem:[%s2059_s1] sm:$0xff] }
  0xd9   :  { %v417_v55 = vpop.f32.mrf.mxu0 }
  0xda   :  { %v506_v58 = vmul.f32 0.2, %v498_v54  ;;  %v418_v62 = vadd.f32 %v417_v55, %v345_v56  ;;  %v311_v56 = vpop.f32.mrf.mxu2 }
  0xdb   :  { %v312_v0 = vadd.f32 %v311_v56, %v1777_v43 }
  0xdc   :  { %v1787_v61 = vmax.f32 %v498_v54, %v506_v58 }
  0xdd   :  { %v470_v63 = vpop.f32.mrf.mxu1 }
  0xde   :  { %v471_v1 = vadd.f32 %v470_v63, %v418_v62  ;;  %v985_v2 = vmul.f32 %v1785_v60, %v1787_v61  ;;  %v724_v63 = vmul.f32 %v1804_v22, %v1787_v61 }
  0xe0   :  { %v499_v4 = vadd.f32 %v1782_v51, %v471_v1  ;;  %1001 = vrot.lane.b32.xlu0 %v985_v2, %s1598_s2  ;;  %v380_v2 = vpop.f32.mrf.mxu3 }
  0xe1   :  { %v421_v5 = vpop.f32.mrf.mxu0 }
  0xe2   :  { %v507_v7 = vmul.f32 0.2, %v499_v4  ;;  %v422_v8 = vadd.f32 %v421_v5, %v351_v6  ;;  %v732_v6 = vsel %vm70_vm0, %v724_v63, 0.0 }
  0xe4   :  { %v1793_v9 = vmax.f32 %v499_v4, %v507_v7 }
  0xe5   :  { %v474_v11 = vpop.f32.mrf.mxu1 }
  0xe6   :  { %v475_v13 = vadd.f32 %v474_v11, %v422_v8  ;;  %v986_v14 = vmul.f32 %v1785_v60, %v1793_v9  ;;  %v381_v8 = vadd.f32 %v380_v2, %v312_v0  ;;  %v725_v12 = vmul.f32 %v1804_v22, %v1793_v9 }
  0xe8   :  { %v500_v15 = vadd.f32 %v1782_v51, %v475_v13  ;;  %1003 = vrot.lane.b32.xlu1 %v986_v14, %s1598_s2  ;;  %v735_v16 = vsel %vm70_vm0, %v725_v12, 0.0 }
  0xe9   :  { %v425_v17 = vpop.f32.mrf.mxu0 }
  0xea   :  { %v508_v19 = vmul.f32 0.2, %v500_v15  ;;  %v426_v20 = vadd.f32 %v425_v17, %v357_v18 }
  0xec   :  { %v1799_v21 = vmax.f32 %v500_v15, %v508_v19 }
  0xed   :  { %v478_v23 = vpop.f32.mrf.mxu1 }
  0xee   :  { %v479_v24 = vadd.f32 %v478_v23, %v426_v20  ;;  %v726_v25 = vmul.f32 %v1804_v22, %v1799_v21  ;;  %v987_v9 = vmul.f32 %v1785_v60, %v1799_v21 }
  0xf0   :  { %v501_v27 = vadd.f32 %v1782_v51, %v479_v24  ;;  %v738_v30 = vsel %vm70_vm0, %v726_v25, 0.0 }
  0xf1   :  { %v429_v29 = vpop.f32.mrf.mxu0  ;;  %739 = vadd.xlane.f32.xlu2 %v738_v30 }
  0xf2   :  { %v509_v31 = vmul.f32 0.2, %v501_v27  ;;  %v430_v45 = vadd.f32 %v429_v29, %v363_v41 }
  0xf4   :  { %v517_v34 = vmax.f32 %v501_v27, %v509_v31 }
  0xf5   :  { %v482_v37 = vpop.f32.mrf.mxu1 }
  0xf6   :  { %v727_v39 = vmul.f32 %v1804_v22, %v517_v34  ;;  %v483_v48 = vadd.f32 %v482_v37, %v430_v45  ;;  %v988_v3 = vmul.f32 %v1785_v60, %v517_v34  ;;  %v1846_v34 = vand.u32 127, %v772_v33 }
  0xf8   :  { %v502_v54 = vadd.f32 %v1782_v51, %v483_v48 }
  0xf9   :  { %v433_v40 = vpop.f32.mrf.mxu0 }
  0xfa   :  { %v434_v46 = vadd.f32 %v433_v40, %v369_v44  ;;  %v510_v59 = vmul.f32 0.2, %v502_v54 }
  0xfc   :  { %v518_v7 = vmax.f32 %v502_v54, %v510_v59 }
  0xfd   :  { %v486_v49 = vpop.f32.mrf.mxu1 }
  0xfe   :  { %v487_v52 = vadd.f32 %v486_v49, %v434_v46  ;;  %v728_v13 = vmul.f32 %v1804_v22, %v518_v7  ;;  %v989_v25 = vmul.f32 %v1785_v60, %v518_v7  ;;  %v1545_v46 = vld [vmem:[%s2064_s6] ss:$0 sm:$0xff] }
  0xff   :  { %v760_v48 = vmul.f32 %v1545_v46, %v1861_v47 }
 0x100   :  { %v503_v53 = vadd.f32 %v1782_v51, %v487_v52  ;;  %v744_v18 = vsel %vm70_vm0, %v728_v13, 0.0 }
 0x101   :  { %v437_v28 = vpop.f32.mrf.mxu0  ;;  %v761_v49 = vsel %vm70_vm0, %v760_v48, 0.0 }
 0x102   :  { %v511_v55 = vmul.f32 0.2, %v503_v53  ;;  %v438_v58 = vadd.f32 %v437_v28, %v375_v32 }
 0x104   :  { %v519_v57 = vmax.f32 %v503_v53, %v511_v55 }
 0x105   :  { %v490_v62 = vpop.f32.mrf.mxu1 }
 0x106   :  { %v491_v1 = vadd.f32 %v490_v62, %v438_v58  ;;  %v729_v36 = vmul.f32 %v1804_v22, %v519_v57  ;;  %v990_v24 = vmul.f32 %v1785_v60, %v519_v57 }
 0x108   :  { %v504_v4 = vadd.f32 %v1782_v51, %v491_v1  ;;  %v1546_v1 = vld [vmem:[%s2064_s6 + $0x1] ss:$0 sm:$0xff] }
 0x109   :  { %v441_v5 = vpop.f32.mrf.mxu0  ;;  %1007 = vrot.lane.b32.xlu2 %v988_v3, %s1598_s2 }
 0x10a   :  { %v512_v10 = vmul.f32 0.2, %v504_v4  ;;  %733 = vadd.xlane.f32.xlu0 %v732_v6  ;;  %v442_v11 = vadd.f32 %v441_v5, %v381_v8 }
 0x10c   :  { %v520_v61 = vmax.f32 %v504_v4, %v512_v10 }
 0x10d   :  { %v494_v43 = vpop.f32.mrf.mxu1 }
 0x10e   :  { %v495_v14 = vadd.f32 %v494_v43, %v442_v11  ;;  %v730_v15 = vmul.f32 %v1804_v22, %v520_v61  ;;  %v991_v21 = vmul.f32 %v1785_v60, %v520_v61 }
 0x110   :  { %v505_v17 = vadd.f32 %v1782_v51, %v495_v14  ;;  %v741_v51 = vsel %vm70_vm0, %v727_v39, 0.0  ;;  %v750_v30 = vsel %vm70_vm0, %v730_v15, 0.0  ;;  %v799_v15 = vstv %s798_s5 }
 0x112   :  { %v513_v19 = vmul.f32 0.2, %v505_v17  ;;  %736 = vadd.xlane.f32.xlu1 %v735_v16  ;;  %745 = vadd.xlane.f32.xlu0 %v744_v18  ;;  %v57_v16 = vld [vmem:[%s2062_s4] sm:$0xff]  ;;  %s1537_s4 = sld [smem:[#allocation2 + $0x1]] }
 0x113   :  { %vm522_vm8 = vcmp.eq.f32.partialorder %v57_v16, 1.0 }
 0x114   :  { %v521_v20 = vmax.f32 %v505_v17, %v513_v19 }
 0x116   :  { %v731_v23 = vmul.f32 %v1804_v22, %v521_v20  ;;  %v747_v22 = vsel %vm70_vm0, %v729_v36, 0.0  ;;  %v992_v44 = vmul.f32 %v1785_v60, %v521_v20  ;;  %v1054_v36 = vmul.f32 %v1546_v1, %v1861_v47  ;;  %v527_v1 = vld [vmem:[%s2067_s9 + $0x18] sm:$0xff] }
 0x118   :  { %v753_v26 = vsel %vm70_vm0, %v731_v23, 0.0  ;;  %v1055_v2 = vsel %vm70_vm0, %v1054_v36, 0.0  ;;  %v1599_v23 = vmov -3.4028235e+38   ;;  %v526_v36 = vld [vmem:[%s2067_s9 + $0x10] sm:$0xff] }
 0x126   :  { %1011 = vrot.lane.b32.xlu0 %v990_v24, %s1598_s2  ;;  %v523_v24 = vsel %vm522_vm8, 0.0, %v1599_v23  ;;  %v533_v23 = vsel %vm70_vm0, %v1861_v47, 0 }
 0x12b   :  { %1005 = vrot.lane.b32.xlu1 %v987_v9, %s1598_s2 }
 0x132   :  { %742 = vadd.xlane.f32.xlu2 %v741_v51 }
 0x14a   :  { %1009 = vrot.lane.b32.xlu2 %v989_v25, %s1598_s2 }
 0x150   :  { %754 = vadd.xlane.f32.xlu0 %v753_v26 }
 0x152   :  { %v1002_v31 = vpop.permute.xlu0 %1001 }
 0x153   :  { %v1025_v63 = vsel %vm70_vm0, %v1002_v31, 0.0 }
 0x155   :  { %748 = vadd.xlane.f32.xlu1 %v747_v22 }
 0x15a   :  { %v1004_v27 = vpop.permute.xlu1 %1003 }
 0x15b   :  { %v1028_v29 = vsel %vm70_vm0, %v1004_v27, 0.0 }
 0x15c   :  { %1029 = vadd.xlane.f32.xlu0 %v1028_v29 }
 0x164   :  { %v740_v37 = vpop.xlane.xlu2 %739 }
 0x165   :  { %v776_v41 = vperm.slane %v740_v37, %v1846_v34 }
 0x16c   :  { %v1008_v60 = vpop.permute.xlu2 %1007 }
 0x16d   :  { %v1034_v0 = vsel %vm70_vm0, %v1008_v60, 0.0 }
 0x16e   :  { %1013 = vrot.lane.b32.xlu1 %v991_v21, %s1598_s2 }
 0x173   :  { %751 = vadd.xlane.f32.xlu2 %v750_v30 }
 0x17d   :  { %v734_v35 = vpop.xlane.xlu0 %733 }
 0x17e   :  { %v774_v39 = vperm.slane %v734_v35, %v1846_v34 }
 0x185   :  { %v737_v38 = vpop.xlane.xlu1 %736  ;;  %v746_v50 = vpop.xlane.xlu0 %745 }
 0x186   :  { %v775_v40 = vperm.slane %v737_v38, %v1846_v34  ;;  %v778_v55 = vperm.slane %v746_v50, %v1846_v34 }
 0x188   :  { %v783_v42 = vsel %vm782_vm1, %v775_v40, %v774_v39 }
 0x189   :  { %v785_v45 = vsel %vm784_vm2, %v776_v41, %v783_v42 }
 0x18b   :  { %1015 = vrot.lane.b32.xlu2 %v992_v44, %s1598_s2 }
 0x198   :  { %762 = vadd.xlane.f32.xlu1 %v761_v49  ;;  %v1012_v28 = vpop.permute.xlu0 %1011 }
 0x199   :  { %v1040_v56 = vsel %vm70_vm0, %v1012_v28, 0.0  ;;  %v1084_v28 = vstv %s1537_s4 }
 0x19d   :  { %v1006_v52 = vpop.permute.xlu1 %1005 }
 0x19e   :  { %v1031_v53 = vsel %vm70_vm0, %v1006_v52, 0.0 }
 0x1a0   :  { %1032 = vadd.xlane.f32.xlu1 %v1031_v53 }
 0x1a5   :  { %v743_v54 = vpop.xlane.xlu2 %742 }
 0x1a6   :  { %v777_v32 = vperm.slane %v743_v54, %v1846_v34 }
 0x1a8   :  { %v787_v57 = vsel %vm786_vm3, %v777_v32, %v785_v45  ;;  %1041 = vadd.xlane.f32.xlu1 %v1040_v56 }
 0x1a9   :  { %v789_v58 = vsel %vm788_vm4, %v778_v55, %v787_v57 }
 0x1ad   :  { %v1010_v59 = vpop.permute.xlu2 %1009 }
 0x1ae   :  { %v1037_v62 = vsel %vm70_vm0, %v1010_v59, 0.0 }
 0x1af   :  { %1038 = vadd.xlane.f32.xlu0 %v1037_v62 }
 0x1b0   :  { %1056 = vadd.xlane.f32.xlu1 %v1055_v2  ;;  %v525_v2 = vld [vmem:[%s2067_s9 + $0x8] sm:$0xff] }
 0x1b4   :  { %1026 = vadd.xlane.f32.xlu2 %v1025_v63 }
 0x1bc   :  { %1035 = vadd.xlane.f32.xlu2 %v1034_v0 }
 0x1c3   :  { %v755_v11 = vpop.xlane.xlu0 %754 }
 0x1c4   :  { %v781_v13 = vperm.slane %v755_v11, %v1846_v34 }
 0x1c8   :  { %v749_v3 = vpop.xlane.xlu1 %748 }
 0x1c9   :  { %v779_v10 = vperm.slane %v749_v3, %v1846_v34  ;;  %v547_v3 = vand.u32 4294901760, %v527_v1 }
 0x1cb   :  { %v791_v43 = vsel %vm790_vm5, %v779_v10, %v789_v58  ;;  %548 = vmatpush.msrb.mxu2 %v547_v3 }
 0x1cf   :  { %v1030_v27 = vpop.xlane.xlu0 %1029 }
 0x1d0   :  { %v1067_v30 = vperm.slane %v1030_v27, %v1846_v34 }
 0x1e0   :  { %v1014_v4 = vpop.permute.xlu1 %1013 }
 0x1e1   :  { %v1043_v5 = vsel %vm70_vm0, %v1014_v4, 0.0  ;;  %v549_v4 = vand.u32 4294901760, %v526_v36 }
 0x1e2   :  { %1044 = vadd.xlane.f32.xlu2 %v1043_v5  ;;  %v551_v5 = vand.u32 4294901760, %v525_v2 }
 0x1e3   :  { %v583_v10 = vsub.f32 %v526_v36, %v549_v4  ;;  %550 = vmatpush.msrb.mxu2 %v549_v4 }
 0x1e5   :  { %552 = vmatpush.msrb.mxu2 %v551_v5 }
 0x1e6   :  { %v752_v6 = vpop.xlane.xlu2 %751 }
 0x1e7   :  { %v780_v61 = vperm.slane %v752_v6, %v1846_v34  ;;  %v524_v6 = vld [vmem:[%s2067_s9] sm:$0xff] }
 0x1e9   :  { %v793_v12 = vsel %vm792_vm6, %v780_v61, %v791_v43  ;;  %v589_v61 = vsub.f32 %v525_v2, %v551_v5  ;;  %v1547_v2 = vld [vmem:[%s2069_s11] ss:$0 sm:$0xff] }
 0x1ea   :  { %v795_v14 = vsel %vm794_vm7, %v781_v13, %v793_v12  ;;  %v584_v12 = vand.u32 4294901760, %v583_v10 }
 0x1eb   :  { %v590_v13 = vand.u32 4294901760, %v589_v61 }
 0x1ed   :  { %v591_v16 = vsub.f32 %v589_v61, %v590_v13 }
 0x1ee   :  { %v1016_v7 = vpop.permute.xlu2 %1015 }
 0x1ef   :  { %v1046_v8 = vsel %vm70_vm0, %v1016_v7, 0.0  ;;  %v553_v7 = vand.u32 4294901760, %v524_v6 }
 0x1f0   :  { %1047 = vadd.xlane.f32.xlu0 %v1046_v8  ;;  %v577_v8 = vsub.f32 %v527_v1, %v547_v3 }
 0x1f1   :  { %v595_v11 = vsub.f32 %v524_v6, %v553_v7  ;;  %554 = vmatpush.msrb.mxu2 %v553_v7 }
 0x1f2   :  { %v578_v43 = vand.u32 4294901760, %v577_v8 }
 0x1f3   :  { %619 = vmatpush.msra.mxu2 %v577_v8 }
 0x1f5   :  { %622 = vmatpush.msra.mxu2 %v583_v10 }
 0x1f7   :  { %625 = vmatpush.msra.mxu2 %v589_v61 }
 0x1f9   :  { %628 = vmatpush.msra.mxu2 %v595_v11 }
 0x20b   :  { %v763_v17 = vpop.xlane.xlu1 %762 }
 0x20c   :  { %v797_v18 = vadd.f32 %v795_v14, %v763_v17  ;;  %v596_v14 = vand.u32 4294901760, %v595_v11  ;;  %v585_v17 = vsub.f32 %v583_v10, %v584_v12 }
 0x20e   :  { %v800_v19 = vadd.f32 %v799_v15, %v797_v18  ;;  %v579_v15 = vsub.f32 %v577_v8, %v578_v43 }
 0x210   :  { %v801_v20 = vmul.f32 0.2, %v800_v19  ;;  %v580_v18 = vand.u32 4294901760, %v579_v15 }
 0x212   :  { %v802_v9 = vmax.f32 %v800_v19, %v801_v20  ;;  %v586_v19 = vand.u32 4294901760, %v585_v17  ;;  %v597_v20 = vsub.f32 %v595_v11, %v596_v14  ;;  %581 = vmatpush.msrb.mxu3 %v580_v18 }
 0x213   :  { %v1033_v22 = vpop.xlane.xlu1 %1032 }
 0x214   :  { %v803_v51 = vadd.f32 %v802_v9, %v523_v24  ;;  %v1068_v35 = vperm.slane %v1033_v22, %v1846_v34  ;;  %587 = vmatpush.msrb.mxu3 %v586_v19  ;;  %v598_v9 = vand.u32 4294901760, %v597_v20 }
 0x216   :  { %v805_v25 = vsel %vm804_vm9, %v803_v51, -inf }
 0x217   :  { %806 = vmax.xlane.f32.xlu2 %v805_v25 }
 0x21b   :  { %v1042_v38 = vpop.xlane.xlu1 %1041 }
 0x21c   :  { %v1071_v46 = vperm.slane %v1042_v38, %v1846_v34 }
 0x222   :  { %v1039_v37 = vpop.xlane.xlu0 %1038 }
 0x223   :  { %v1070_v42 = vperm.slane %v1039_v37, %v1846_v34  ;;  %v1057_v60 = vpop.xlane.xlu1 %1056 }
 0x227   :  { %v1027_v26 = vpop.xlane.xlu2 %1026 }
 0x228   :  { %v1066_v29 = vperm.slane %v1027_v26, %v1846_v34 }
 0x22a   :  { %v1074_v31 = vsel %vm782_vm1, %v1067_v30, %v1066_v29 }
 0x22b   :  { %v1075_v39 = vsel %vm784_vm2, %v1068_v35, %v1074_v31 }
 0x22f   :  { %v1036_v21 = vpop.xlane.xlu2 %1035 }
 0x230   :  { %v1069_v33 = vperm.slane %v1036_v21, %v1846_v34 }
 0x232   :  { %v1076_v40 = vsel %vm786_vm3, %v1069_v33, %v1075_v39  ;;  %v55_v33 = vld [vmem:[%s2058_s0] sm:$0xff]  ;;  %vm1275_vm3 = vcmask 523264  }
 0x233   :  { %v1077_v44 = vsel %vm788_vm4, %v1070_v42, %v1076_v40  ;;  %v847_v35 = vand.u32 4294901760, %v55_v33 }
 0x234   :  { %v1078_v50 = vsel %vm790_vm5, %v1071_v46, %v1077_v44 }
 0x235   :  { %v874_v37 = vsub.f32 %v55_v33, %v847_v35  ;;  %1256 = vmatpush.msra.mxu1 %v847_v35 }
 0x237   :  { %v875_v38 = vand.u32 4294901760, %v874_v37 }
 0x239   :  { %v876_v39 = vsub.f32 %v874_v37, %v875_v38  ;;  %1234 = vmatpush.msra.mxu0 %v875_v38 }
 0x23b   :  { %v877_v40 = vand.u32 4294901760, %v876_v39  ;;  %v1272_v39 = vld [vmem:[%s2068_s10 + $0x28] sm:$0xff] }
 0x255   :  { %v1045_v41 = vpop.xlane.xlu2 %1044 }
 0x256   :  { %v1072_v45 = vperm.slane %v1045_v41, %v1846_v34 }
 0x258   :  { %v1079_v52 = vsel %vm792_vm6, %v1072_v45, %v1078_v50 }
 0x263   :  { %v1048_v48 = vpop.xlane.xlu0 %1047 }
 0x264   :  { %v1073_v49 = vperm.slane %v1048_v48, %v1846_v34 }
 0x266   :  { %v1080_v53 = vsel %vm794_vm7, %v1073_v49, %v1079_v52 }
 0x267   :  { %v1082_v54 = vadd.f32 %v1080_v53, %v1057_v60 }
 0x269   :  { %v1085_v32 = vadd.f32 %v1084_v28, %v1082_v54 }
 0x26b   :  { %v1086_v55 = vmul.f32 0.2, %v1085_v32 }
 0x26d   :  { %v1087_v56 = vmax.f32 %v1085_v32, %v1086_v55 }
 0x26f   :  { %v1088_v57 = vadd.f32 %v1087_v56, %v523_v24  ;;  %v592_v24 = vand.u32 4294901760, %v591_v16 }
 0x271   :  { %v1089_v58 = vsel %vm804_vm9, %v1088_v57, -inf  ;;  %593 = vmatpush.msrb.mxu3 %v592_v24 }
 0x272   :  { %1090 = vmax.xlane.f32.xlu0 %v1089_v58 }
 0x273   :  { %599 = vmatpush.msrb.mxu3 %v598_v9 }
 0x275   :  { %648 = vmatpush.msra.mxu3 %v547_v3 }
 0x277   :  { %650 = vmatpush.msra.mxu3 %v549_v4 }
 0x279   :  { %652 = vmatpush.msra.mxu3 %v551_v5 }
 0x27b   :  { %654 = vmatpush.msra.mxu3 %v553_v7 }
 0x28a   :  { %v807_v59 = vpop.xlane.xlu2 %806 }
 0x28b   :  { %v808_v62 = vsub.f32 %v803_v51, %v807_v59  ;;  %v555_v51 = vand.u32 4294901760, %v533_v23 }
 0x28d   :  { %v809_v63 = vmul.f32 1.442695, %v808_v62  ;;  %601 = vmatmul.f32.vlgmr.msrb.gmra.mxu3 %v555_v51  ;;  %v556_v27 = vsub.f32 %v533_v23, %v555_v51 }
 0x28e   :  { %708 = vmatpush.msrb.mxu3 %v547_v3 }
 0x28f   :  { %1548 = vpow2.f32 %v809_v63  ;;  %v557_v47 = vand.u32 4294901760, %v556_v27 }
 0x290   :  { %710 = vmatpush.msrb.mxu3 %v549_v4 }
 0x291   :  { %v558_v29 = vsub.f32 %v556_v27, %v557_v47 }
 0x292   :  { %712 = vmatpush.msrb.mxu3 %v551_v5 }
 0x293   :  { %v559_v30 = vand.u32 4294901760, %v558_v29 }
 0x294   :  { %714 = vmatpush.msrb.mxu3 %v553_v7 }
 0x295   :  { %v1907_v34 = vpop.eup %1548  ;;  %658 = vmatmul.f32.vlgmr.msra.gmra.mxu3 %v557_v47  ;;  %560 = vmatmul.f32.vlgmr.msrb.gmra.mxu2 %v559_v30 }
 0x296   :  { %v811_v0 = vsel %vm804_vm9, %v1907_v34, 0.0  ;;  %677 = vmatpush.msrb.mxu2 %v578_v43  ;;  %878 = vmatpush.msra.mxu3 %v877_v40 }
 0x297   :  { %812 = vadd.xlane.f32.xlu1 %v811_v0 }
 0x298   :  { %681 = vmatpush.msrb.mxu2 %v584_v12 }
 0x29a   :  { %685 = vmatpush.msrb.mxu2 %v590_v13 }
 0x29c   :  { %689 = vmatpush.msrb.mxu2 %v596_v14 }
 0x29d   :  { %716 = vmatmul.f32.vlgmr.msrb.gmra.mxu3 %v555_v51  ;;  %631 = vmatmul.f32.vlgmr.msra.gmra.mxu2 %v556_v27 }
 0x29e   :  { %848 = vmatpush.msra.mxu2 %v847_v35  ;;  %924 = vmatpush.msrb.mxu3 %v847_v35 }
 0x2a5   :  { %691 = vmatmul.f32.vlgmr.msrb.gmra.mxu2 %v555_v51 }
 0x2a6   :  { %901 = vmatpush.msrb.mxu2 %v874_v37 }
 0x2e5   :  { %v1091_v25 = vpop.xlane.xlu0 %1090 }
 0x2e6   :  { %v1092_v26 = vsub.f32 %v1088_v57, %v1091_v25 }
 0x2e8   :  { %v1093_v22 = vmul.f32 1.442695, %v1092_v26 }
 0x2ea   :  { %1550 = vpow2.f32 %v1093_v22 }
 0x2f0   :  { %v1925_v21 = vpop.eup %1550 }
 0x2f1   :  { %v1095_v31 = vsel %vm804_vm9, %v1925_v21, 0.0 }
 0x2f2   :  { %1096 = vadd.xlane.f32.xlu2 %v1095_v31 }
 0x30a   :  { %v813_v41 = vpop.xlane.xlu1 %812 }
 0x30b   :  { %1552 = vrcp.f32 %v813_v41  ;;  %v825_v46 = vand.u32 2147483648, %v813_v41  ;;  %v823_v49 = vand.u32 2147483647, %v813_v41  ;;  %vm819_vm11 = vweird.f32 %v813_v41 }
 0x30d   :  { %v826_v60 = vor.u32 1.1754944e-38, %v825_v46  ;;  %vm824_vm13 = vcmp.eq.f32.partialorder %v823_v49, 8.507059e+37  ;;  %v1269_v46 = vld [vmem:[%s2068_s10 + $0x10] sm:$0xff] }
 0x310   :  { %v602_v4 = vpop.f32.mrf.mxu3 }
 0x311   :  { %v1553_v42 = vpop.eup %1552 }
 0x312   :  { %v815_v44 = vmul.f32 %v1553_v42, %v813_v41  ;;  %vm820_vm10 = vweird.f32 %v1553_v42 }
 0x313   :  { %vm821_vm12 = vmor %vm819_vm11, %vm820_vm10 }
 0x314   :  { %v816_v45 = vsub.f32 1.0, %v815_v44  ;;  %v1271_v44 = vld [vmem:[%s2068_s10 + $0x20] sm:$0xff] }
 0x316   :  { %v817_v48 = vmul.f32 %v1553_v42, %v816_v45  ;;  %v1270_v45 = vld [vmem:[%s2068_s10 + $0x18] sm:$0xff] }
 0x317   :  { %v1969_v49 = vand.u32 4294901760, %v1270_v45 }
 0x318   :  { %v818_v50 = vadd.f32 %v1553_v42, %v817_v48  ;;  %v561_v7 = vpop.f32.mrf.mxu2  ;;  %v659_v14 = vpop.f32.mrf.mxu3  ;;  %v1967_v48 = vand.u32 4294901760, %v1271_v44 }
 0x319   :  { %v562_v10 = vadd.f32 %v1547_v2, %v561_v7 }
 0x31a   :  { %v822_v52 = vsel %vm821_vm12, %v1553_v42, %v818_v50  ;;  %v1956_v42 = vand.u32 4294901760, %v1272_v39  ;;  %v1971_v50 = vand.u32 4294901760, %v1269_v46 }
 0x31b   :  { %v827_v53 = vsel %vm824_vm13, %v826_v60, %v822_v52  ;;  %v603_v11 = vadd.f32 %v602_v4, %v562_v10  ;;  %v1268_v60 = vld [vmem:[%s2068_s10 + $0x8] sm:$0xff]  ;;  %v1267_v52 = vld [vmem:[%s2068_s10] sm:$0xff] }
 0x31c   :  { %v828_v28 = vmul.f32 %v1907_v34, %v827_v53 }
 0x31e   :  { %v830_v54 = vsel %vm804_vm9, %v828_v28, 0 }
 0x31f   :  { %v849_v32 = vand.u32 4294901760, %v830_v54 }
 0x320   :  { %v632_v15 = vpop.f32.mrf.mxu2  ;;  %v717_v9 = vpop.f32.mrf.mxu3 }
 0x321   :  { %v850_v55 = vsub.f32 %v830_v54, %v849_v32  ;;  %880 = vmatmul.f32.vlgmr.msra.gmra.mxu3 %v849_v32  ;;  %v633_v16 = vadd.f32 %v632_v15, %v603_v11  ;;  %v1986_v54 = vsub.f32 %v1272_v39, %v1956_v42 }
 0x322   :  { %972 = vmatpush.msra.mxu3 %v847_v35 }
 0x323   :  { %v851_v56 = vand.u32 4294901760, %v850_v55  ;;  %v660_v19 = vadd.f32 %v659_v14, %v633_v16 }
 0x325   :  { %v852_v57 = vsub.f32 %v850_v55, %v851_v56 }
 0x327   :  { %v853_v58 = vand.u32 4294901760, %v852_v57  ;;  %v1999_v57 = vsub.f32 %v1269_v46, %v1971_v50 }
 0x328   :  { %v692_v23 = vpop.f32.mrf.mxu2 }
 0x329   :  { %854 = vmatmul.f32.vlgmr.msra.gmra.mxu2 %v853_v58  ;;  %928 = vmatmul.f32.vlgmr.msrb.gmra.mxu3 %v851_v56  ;;  %v693_v24 = vadd.f32 %v692_v23, %v660_v19  ;;  %v1996_v56 = vsub.f32 %v1270_v45, %v1969_v49  ;;  %v1352_v4 = vand.u32 4294901760, %v1999_v57 }
 0x32a   :  { %950 = vmatpush.msra.mxu2 %v875_v38  ;;  %1162 = vmatpush.msrb.mxu3 %v877_v40  ;;  %v1273_v38 = vld [vmem:[%s2068_s10 + $0x30] sm:$0xff] }
 0x32b   :  { %v1939_v51 = vadd.f32 %v717_v9, %v693_v24  ;;  %v1954_v41 = vand.u32 4294901760, %v1273_v38 }
 0x32d   :  { %v1983_v28 = vsub.f32 %v1273_v38, %v1954_v41 }
 0x331   :  { %904 = vmatmul.f32.vlgmr.msrb.gmra.mxu2 %v850_v55  ;;  %974 = vmatmul.f32.vlgmr.msra.gmra.mxu3 %v849_v32  ;;  %v1993_v55 = vsub.f32 %v1271_v44, %v1967_v48 }
 0x332   :  { %1132 = vmatpush.msrb.mxu2 %v847_v35  ;;  %1208 = vmatpush.msra.mxu3 %v847_v35 }
 0x339   :  { %952 = vmatmul.f32.vlgmr.msra.gmra.mxu2 %v849_v32  ;;  %v1990_v32 = vand.u32 4294901760, %v1268_v60 }
 0x33a   :  { %1185 = vmatpush.msra.mxu2 %v874_v37  ;;  %v1274_v37 = vld [vmem:[%s2068_s10 + $0x38] sm:$0xff]  ;;  %s1600_s10 = smov [#allocation5]  }
 0x33b   :  { %v1952_v40 = vand.u32 4294901760, %v1274_v37 }
 0x33d   :  { %v1980_v53 = vsub.f32 %v1274_v37, %v1952_v40  ;;  %1420 = vmatpush.msrb.mxu1 %v1952_v40 }
 0x33f   :  { %v1322_v58 = vand.u32 4294901760, %v1980_v53  ;;  %1383 = vmatpush.msrb.mxu0 %v1980_v53  ;;  %1422 = vmatpush.msrb.mxu1 %v1954_v41 }
 0x341   :  { %1386 = vmatpush.msrb.mxu0 %v1983_v28  ;;  %1424 = vmatpush.msrb.mxu1 %v1956_v42 }
 0x343   :  { %1389 = vmatpush.msrb.mxu0 %v1986_v54  ;;  %1426 = vmatpush.msrb.mxu1 %v1967_v48 }
 0x345   :  { %1392 = vmatpush.msrb.mxu0 %v1993_v55  ;;  %1428 = vmatpush.msrb.mxu1 %v1969_v49 }
 0x347   :  { %1395 = vmatpush.msrb.mxu0 %v1996_v56  ;;  %1430 = vmatpush.msrb.mxu1 %v1971_v50 }
 0x349   :  { %1398 = vmatpush.msrb.mxu0 %v1999_v57  ;;  %1432 = vmatpush.msrb.mxu1 %v1990_v32 }
 0x365   :  { %v1097_v59 = vpop.xlane.xlu2 %1096 }
 0x366   :  { %1554 = vrcp.f32 %v1097_v59  ;;  %v1109_v0 = vand.u32 2147483648, %v1097_v59  ;;  %v1107_v36 = vand.u32 2147483647, %v1097_v59  ;;  %vm1103_vm15 = vweird.f32 %v1097_v59 }
 0x368   :  { %v1110_v5 = vor.u32 1.1754944e-38, %v1109_v0  ;;  %vm1108_vm2 = vcmp.eq.f32.partialorder %v1107_v36, 8.507059e+37  ;;  %v2010_v0 = vsub.f32 %v1268_v60, %v1990_v32 }
 0x36a   :  { %v1358_v11 = vand.u32 4294901760, %v2010_v0  ;;  %1401 = vmatpush.msrb.mxu0 %v2010_v0 }
 0x36c   :  { %v1555_v62 = vpop.eup %1554  ;;  %v1359_v16 = vsub.f32 %v2010_v0, %v1358_v11 }
 0x36d   :  { %v1099_v63 = vmul.f32 %v1555_v62, %v1097_v59  ;;  %vm1104_vm14 = vweird.f32 %v1555_v62  ;;  %v1328_v59 = vand.u32 4294901760, %v1983_v28 }
 0x36e   :  { %vm1105_vm1 = vmor %vm1103_vm15, %vm1104_vm14 }
 0x36f   :  { %v1100_v34 = vsub.f32 1.0, %v1099_v63  ;;  %v2006_v63 = vand.u32 4294901760, %v1267_v52  ;;  %v1329_v36 = vsub.f32 %v1983_v28, %v1328_v59 }
 0x371   :  { %v1101_v1 = vmul.f32 %v1555_v62, %v1100_v34  ;;  %v1340_v34 = vand.u32 4294901760, %v1993_v55  ;;  %1434 = vmatpush.msrb.mxu1 %v2006_v63 }
 0x373   :  { %v1102_v3 = vadd.f32 %v1555_v62, %v1101_v1  ;;  %v1323_v1 = vsub.f32 %v1980_v53, %v1322_v58  ;;  %v1341_v7 = vsub.f32 %v1993_v55, %v1340_v34 }
 0x375   :  { %v1106_v6 = vsel %vm1105_vm1, %v1555_v62, %v1102_v3  ;;  %v1334_v62 = vand.u32 4294901760, %v1986_v54  ;;  %v1346_v3 = vand.u32 4294901760, %v1996_v56 }
 0x376   :  { %v1111_v8 = vsel %vm1108_vm2, %v1110_v5, %v1106_v6  ;;  %v1324_v5 = vand.u32 4294901760, %v1323_v1  ;;  %v1330_v6 = vand.u32 4294901760, %v1329_v36 }
 0x377   :  { %v1112_v61 = vmul.f32 %v1925_v21, %v1111_v8  ;;  %v1335_v2 = vsub.f32 %v1986_v54, %v1334_v62  ;;  %v1363_v8 = vsub.f32 %v1267_v52, %v2006_v63 }
 0x379   :  { %v1114_v43 = vsel %vm804_vm9, %v1112_v61, 0  ;;  %v1336_v10 = vand.u32 4294901760, %v1335_v2  ;;  %v1347_v61 = vsub.f32 %v1996_v56, %v1346_v3  ;;  %1404 = vmatpush.msrb.mxu0 %v1363_v8 }
 0x37a   :  { %v1133_v12 = vand.u32 4294901760, %v1114_v43 }
 0x37c   :  { %v1134_v13 = vsub.f32 %v1114_v43, %v1133_v12  ;;  %1164 = vmatmul.f32.vlgmr.msrb.gmra.mxu3 %v1133_v12  ;;  %1236 = vmatmul.f32.vlgmr.msra.gmra.mxu0 %v1133_v12  ;;  %v1342_v43 = vand.u32 4294901760, %v1341_v7 }
 0x37d   :  { %1258 = vmatmul.f32.vlgmr.msra.gmra.mxu1 %v1133_v12  ;;  %1325 = vmatpush.msrb.mxu3 %v1324_v5  ;;  %v1353_v12 = vsub.f32 %v1999_v57, %v1352_v4 }
 0x37e   :  { %v1135_v17 = vand.u32 4294901760, %v1134_v13 }
 0x37f   :  { %1331 = vmatpush.msrb.mxu3 %v1330_v6 }
 0x380   :  { %v1136_v18 = vsub.f32 %v1134_v13, %v1135_v17 }
 0x381   :  { %1337 = vmatpush.msrb.mxu3 %v1336_v10 }
 0x382   :  { %v1137_v20 = vand.u32 4294901760, %v1136_v18  ;;  %v1354_v18 = vand.u32 4294901760, %v1353_v12 }
 0x383   :  { %1343 = vmatpush.msrb.mxu3 %v1342_v43 }
 0x384   :  { %1138 = vmatmul.f32.vlgmr.msrb.gmra.mxu2 %v1137_v20  ;;  %1212 = vmatmul.f32.vlgmr.msra.gmra.mxu3 %v1135_v17  ;;  %v1348_v17 = vand.u32 4294901760, %v1347_v61  ;;  %v1360_v20 = vand.u32 4294901760, %v1359_v16 }
 0x385   :  { %1288 = vmatpush.msrb.mxu2 %v1952_v40 }
 0x386   :  { %1349 = vmatpush.msrb.mxu3 %v1348_v17 }
 0x387   :  { %1290 = vmatpush.msrb.mxu2 %v1954_v41 }
 0x388   :  { %1355 = vmatpush.msrb.mxu3 %v1354_v18 }
 0x389   :  { %1292 = vmatpush.msrb.mxu2 %v1956_v42 }
 0x38a   :  { %1361 = vmatpush.msrb.mxu3 %v1360_v20 }
 0x38b   :  { %1294 = vmatpush.msrb.mxu2 %v1967_v48 }
 0x38c   :  { %1188 = vmatmul.f32.vlgmr.msra.gmra.mxu2 %v1134_v13  ;;  %v1364_v13 = vand.u32 4294901760, %v1363_v8 }
 0x38d   :  { %1296 = vmatpush.msrb.mxu2 %v1969_v49 }
 0x38e   :  { %v1365_v19 = vsub.f32 %v1363_v8, %v1364_v13 }
 0x38f   :  { %1298 = vmatpush.msrb.mxu2 %v1971_v50 }
 0x390   :  { %v1366_v23 = vand.u32 4294901760, %v1365_v19 }
 0x391   :  { %1300 = vmatpush.msrb.mxu2 %v1990_v32 }
 0x392   :  { %1367 = vmatpush.msrb.mxu3 %v1366_v23 }
 0x393   :  { %1302 = vmatpush.msrb.mxu2 %v2006_v63 }
 0x394   :  { %1496 = vmatpush.msra.mxu3 %v1952_v40 }
 0x395   :  { %1453 = vmatpush.msra.mxu2 %v1322_v58 }
 0x396   :  { %1498 = vmatpush.msra.mxu3 %v1954_v41 }
 0x397   :  { %1457 = vmatpush.msra.mxu2 %v1328_v59 }
 0x398   :  { %1500 = vmatpush.msra.mxu3 %v1956_v42 }
 0x399   :  { %1461 = vmatpush.msra.mxu2 %v1334_v62 }
 0x39a   :  { %1502 = vmatpush.msra.mxu3 %v1967_v48 }
 0x39b   :  { %1465 = vmatpush.msra.mxu2 %v1340_v34 }
 0x39c   :  { %1504 = vmatpush.msra.mxu3 %v1969_v49 }
 0x39d   :  { %1469 = vmatpush.msra.mxu2 %v1346_v3 }
 0x39e   :  { %1506 = vmatpush.msra.mxu3 %v1971_v50 }
 0x39f   :  { %1473 = vmatpush.msra.mxu2 %v1352_v4 }
 0x3a0   :  { %1508 = vmatpush.msra.mxu3 %v1990_v32 }
 0x3a1   :  { %1477 = vmatpush.msra.mxu2 %v1358_v11 }
 0x3a2   :  { %1510 = vmatpush.msra.mxu3 %v2006_v63 }
 0x3a3   :  { %1481 = vmatpush.msra.mxu2 %v1364_v13 }
 0x3a4   :  { %v881_v25 = vpop.f32.mrf.mxu3 }
 0x3ac   :  { %v855_v26 = vpop.f32.mrf.mxu2  ;;  %v929_v27 = vpop.f32.mrf.mxu3 }
 0x3ad   :  { %v882_v22 = vadd.f32 %v881_v25, %v855_v26 }
 0x3b4   :  { %v905_v47 = vpop.f32.mrf.mxu2  ;;  %v975_v33 = vpop.f32.mrf.mxu3 }
 0x3b5   :  { %v906_v29 = vadd.f32 %v905_v47, %v882_v22 }
 0x3b7   :  { %v930_v21 = vadd.f32 %v929_v27, %v906_v29 }
 0x3bc   :  { %v953_v30 = vpop.f32.mrf.mxu2 }
 0x3bd   :  { %v954_v31 = vadd.f32 %v953_v30, %v930_v21 }
 0x3bf   :  { %v1941_v35 = vadd.f32 %v975_v33, %v954_v31 }
 0x3f9   :  { %v1237_v27 = vpop.f32.mrf.mxu0 }
 0x3fa   :  { %v1259_v29 = vpop.f32.mrf.mxu1 }
 0x3ff   :  { %v1165_v14 = vpop.f32.mrf.mxu3 }
 0x407   :  { %v1139_v15 = vpop.f32.mrf.mxu2  ;;  %v1213_v26 = vpop.f32.mrf.mxu3 }
 0x408   :  { %v1166_v24 = vadd.f32 %v1165_v14, %v1139_v15 }
 0x40f   :  { %v1189_v9 = vpop.f32.mrf.mxu2 }
 0x410   :  { %v1190_v25 = vadd.f32 %v1189_v9, %v1166_v24 }
 0x412   :  { %v1214_v22 = vadd.f32 %v1213_v26, %v1190_v25 }
 0x414   :  { %v1238_v47 = vadd.f32 %v1237_v27, %v1214_v22 }
 0x416   :  { %v1260_v21 = vadd.f32 %v1259_v29, %v1238_v47 }
 0x418   :  { %1263 = vrot.lane.b32.xlu0 %v1260_v21, %s1597_s30  ;;  %s1523_s30 = sshll.u32 %s1600_s10, 4  ;;  %s1524_s30 = int_to_ptr.vmem [resolvable:$true] %s1523_s30 }
 0x48a   :  { %v1264_v30 = vpop.permute.xlu0 %1263 }
 0x48b   :  { %v1266_v31 = vsel %vm70_vm0, %v1941_v35, %v1264_v30 }
 0x48c   :  { %v1277_v33 = vsel %vm1275_vm3, %v1266_v31, 0 }
 0x48d   :  { %v1303_v37 = vand.u32 4294901760, %v1277_v33 }
 0x48f   :  { %v1304_v38 = vsub.f32 %v1277_v33, %v1303_v37  ;;  %1369 = vmatmul.f32.vlgmr.msrb.gmra.mxu3 %v1303_v37 }
 0x491   :  { %1407 = vmatmul.f32.vlgmr.msrb.gmra.mxu0 %v1304_v38  ;;  %v1305_v39 = vand.u32 4294901760, %v1304_v38 }
 0x493   :  { %1438 = vmatmul.f32.vlgmr.msrb.gmra.mxu1 %v1305_v39  ;;  %v1306_v40 = vsub.f32 %v1304_v38, %v1305_v39 }
 0x495   :  { %v1307_v41 = vand.u32 4294901760, %v1306_v40 }
 0x497   :  { %1308 = vmatmul.f32.vlgmr.msrb.gmra.mxu2 %v1307_v41  ;;  %1512 = vmatmul.f32.vlgmr.msra.gmra.mxu3 %v1303_v37 }
 0x49f   :  { %1483 = vmatmul.f32.vlgmr.msra.gmra.mxu2 %v1303_v37 }
 0x50e   :  { %v1408_v46 = vpop.f32.mrf.mxu0 }
 0x510   :  { %v1439_v49 = vpop.f32.mrf.mxu1 }
 0x512   :  { %v1370_v42 = vpop.f32.mrf.mxu3 }
 0x51a   :  { %v1309_v44 = vpop.f32.mrf.mxu2  ;;  %v1513_v52 = vpop.f32.mrf.mxu3 }
 0x51b   :  { %v1371_v45 = vadd.f32 %v1370_v42, %v1309_v44 }
 0x51d   :  { %v1409_v48 = vadd.f32 %v1408_v46, %v1371_v45 }
 0x51f   :  { %v1440_v50 = vadd.f32 %v1439_v49, %v1409_v48 }
 0x522   :  { %v1484_v35 = vpop.f32.mrf.mxu2 }
 0x523   :  { %v1485_v60 = vadd.f32 %v1484_v35, %v1440_v50 }
 0x525   :  { %v1514_v53 = vadd.f32 %v1513_v52, %v1485_v60 }
 0x527   :  { %v1516_v28 = vadd.f32 %v1514_v53, %v1939_v51 }
 0x529   :  { %1517 = vst.msk [vmem:[#allocation5] sm:$0xff] %vm70_vm0, %v1516_v28 }
 0x52a   :  { %1528 = dma.vmem_to_hbm [thread:$0]  %s1524_s30, 128, %s1526_s23, [#allocation3]  }
 0x52b   :  { %1594 = dma.done.wait [#allocation3], 128  }
 0x52c   :  { %1595 = vsyncadd [#allocation3], 4294967168 }
 0x52d   :  { %1533 = vsyncpa [#allocation3], 1 }
 0x52e   :  { %1534 = vsyncpa [#allocation4], 1 }

</bundles_post_ra>
